<compile_context>
chip_gen: v7x
topology: tpu7x:2x2x1
jax: 0.10.0
libtpu: 0.0.40
codegen_flags: <defaults>
</compile_context>

<pallas_src>
import functools
import math

import jax
import jax.numpy as jnp
from jax.experimental import pallas as pl
from jax.experimental.pallas import tpu as pltpu


# ----------------------------- config ---------------------------------------
class Config:
    hidden_size = 32
    num_channels = 3
    image_size = 16
    patch_size = 8
    num_attention_heads = 4
    intermediate_size = 64
    num_hidden_layers = 2
    layer_norm_eps = 1e-6


_GELU_C = math.sqrt(2.0 / math.pi)


def _ln(x, g, b, eps):
    # f32 LayerNorm statistics (biased variance, matches PyTorch).
    mean = jnp.mean(x, axis=-1, keepdims=True)
    var = jnp.mean((x - mean) ** 2, axis=-1, keepdims=True)
    return (x - mean) * jax.lax.rsqrt(var + eps) * g + b


# ----------------------------- fused model kernel ----------------------------
def _model_kernel(
    p_ref, pw_ref, pb_ref, pos_ref,
    ln1g_ref, ln1b_ref, qkvw_ref, qkvb_ref, ow_ref, ob_ref,
    ln2g_ref, ln2b_ref, w1_ref, b1_ref, w2_ref, b2_ref,
    lng_ref, lnb_ref,
    o_ref,
    *, num_layers, nh, hd, eps,
):
    """Whole SigLIP vision forward for one batch element (everything in VMEM).

    p_ref:    (1, N, K) flattened patches
    pw_ref:   (K, D) bf16 patch-embedding weight, pb_ref: (1, D), pos_ref: (N, D)
    qkvw_ref: (L, D, 3D) bf16 fused QKV weights (softmax scale folded into Q)
    ow_ref:   (L, D, D) bf16 output-projection weights
    w1/w2:    (L, D, I)/(L, I, D) bf16 MLP weights
    """
    D = nh * hd
    bf = jnp.bfloat16

    # ---- patch embedding + position embedding ------------------------------
    p = p_ref[0].astype(bf)                                         # (N, K)
    x = (jnp.dot(p, pw_ref[...], preferred_element_type=jnp.float32)
         + pb_ref[...] + pos_ref[...])                              # (N, D) f32

    # ---- encoder layers (static unroll; num_layers is tiny) ----------------
    for l in range(num_layers):
        # LN1 + fused lane-dense QKV projection.
        hn_b = _ln(x, ln1g_ref[l], ln1b_ref[l], eps).astype(bf)
        qkv = (jnp.dot(hn_b, qkvw_ref[l], preferred_element_type=jnp.float32)
               + qkvb_ref[l])                                       # (N, 3D) f32

        # Per-head attention (scores are per-head by definition); contexts are
        # concatenated and fed through ONE full-width output projection.
        ctxs = []
        for h in range(nh):
            lo = h * hd
            qh = qkv[:, lo:lo + hd].astype(bf)                      # (N, hd)
            kh = qkv[:, D + lo:D + lo + hd].astype(bf)
            vh = qkv[:, 2 * D + lo:2 * D + lo + hd].astype(bf)
            s = jax.lax.dot_general(                                # (N, N) f32
                qh, kh, (((1,), (1,)), ((), ())),
                preferred_element_type=jnp.float32)
            s = s - jnp.max(s, axis=-1, keepdims=True)
            e = jnp.exp(s)
            pa = e / jnp.sum(e, axis=-1, keepdims=True)             # exact softmax
            ctxs.append(jnp.dot(pa.astype(bf), vh,
                                preferred_element_type=jnp.float32))
        ctx = jnp.concatenate(ctxs, axis=-1).astype(bf)             # (N, D)
        attn = (jnp.dot(ctx, ow_ref[l], preferred_element_type=jnp.float32)
                + ob_ref[l])
        h1 = x + attn

        # LN2 + MLP (tanh GELU, f32) + residual.
        hn2_b = _ln(h1, ln2g_ref[l], ln2b_ref[l], eps).astype(bf)
        m = (jnp.dot(hn2_b, w1_ref[l], preferred_element_type=jnp.float32)
             + b1_ref[l])
        m = 0.5 * m * (1.0 + jnp.tanh(_GELU_C * (m + 0.044715 * m * m * m)))
        mlp = (jnp.dot(m.astype(bf), w2_ref[l], preferred_element_type=jnp.float32)
               + b2_ref[l])
        x = h1 + mlp

    # ---- final LayerNorm ----------------------------------------------------
    o_ref[0] = _ln(x, lng_ref[...], lnb_ref[...], eps)


# ----------------------------- wrapper ---------------------------------------
def _rep_spec(shape):
    # Block resident across the batch grid axis (constant block index).
    n = len(shape)
    return pl.BlockSpec(shape, lambda b, _n=n: (0,) * _n)


def siglip_forward(patches, p, cfg):
    B, N, K = patches.shape
    D = cfg.hidden_size
    I = cfg.intermediate_size
    L = cfg.num_hidden_layers
    nh = cfg.num_attention_heads
    hd = D // nh

    kernel = functools.partial(
        _model_kernel, num_layers=L, nh=nh, hd=hd, eps=cfg.layer_norm_eps)

    return pl.pallas_call(
        kernel,
        out_shape=jax.ShapeDtypeStruct((B, N, D), jnp.float32),
        grid=(B,),
        in_specs=[
            pl.BlockSpec((1, N, K), lambda b: (b, 0, 0)),           # patches
            _rep_spec((K, D)), _rep_spec((1, D)), _rep_spec((N, D)),  # embed
            _rep_spec((L, 1, D)), _rep_spec((L, 1, D)),             # ln1
            _rep_spec((L, D, 3 * D)), _rep_spec((L, 1, 3 * D)),     # qkv
            _rep_spec((L, D, D)), _rep_spec((L, 1, D)),             # out proj
            _rep_spec((L, 1, D)), _rep_spec((L, 1, D)),             # ln2
            _rep_spec((L, D, I)), _rep_spec((L, 1, I)),             # fc1
            _rep_spec((L, I, D)), _rep_spec((L, 1, D)),             # fc2
            _rep_spec((1, D)), _rep_spec((1, D)),                   # final ln
        ],
        out_specs=pl.BlockSpec((1, N, D), lambda b: (b, 0, 0)),
        compiler_params=pltpu.CompilerParams(
            dimension_semantics=("parallel",)),
    )(
        patches,
        p["patch_w"], p["patch_b"], p["pos_emb"],
        p["ln1_g"], p["ln1_b"], p["qkv_w"], p["qkv_b"], p["o_w"], p["o_b"],
        p["ln2_g"], p["ln2_b"], p["fc1_w"], p["fc1_b"], p["fc2_w"], p["fc2_b"],
        p["ln_g"], p["ln_b"],
    )


# ----------------------------- model -----------------------------------------
def init_params(key, cfg):
    """PyTorch-convention parameters (Linear: (out, in); Conv2d: (out, in, kh, kw))."""
    D = cfg.hidden_size
    C = cfg.num_channels
    P = cfg.patch_size
    I = cfg.intermediate_size
    N = (cfg.image_size // P) ** 2
    keys = iter(jax.random.split(key, 8 + 16 * cfg.num_hidden_layers))

    def w(shape, scale=0.02):
        return (scale * jax.random.normal(next(keys), shape)).astype(jnp.float32)

    params = {
        "patch_w": w((D, C, P, P)),
        "patch_b": w((D,)),
        "pos_emb": w((N, D)),
        "ln_g": jnp.ones((D,), jnp.float32),
        "ln_b": jnp.zeros((D,), jnp.float32),
        "layers": [],
    }
    for _ in range(cfg.num_hidden_layers):
        params["layers"].append(
            {
                "ln1_g": jnp.ones((D,), jnp.float32),
                "ln1_b": jnp.zeros((D,), jnp.float32),
                "q_w": w((D, D)), "q_b": w((D,)),
                "k_w": w((D, D)), "k_b": w((D,)),
                "v_w": w((D, D)), "v_b": w((D,)),
                "o_w": w((D, D)), "o_b": w((D,)),
                "ln2_g": jnp.ones((D,), jnp.float32),
                "ln2_b": jnp.zeros((D,), jnp.float32),
                "fc1_w": w((I, D)), "fc1_b": w((I,)),
                "fc2_w": w((D, I)), "fc2_b": w((D,)),
            }
        )
    return params


def prepare_params(params, cfg):
    """One-time conversion to kernel-ready layouts: fused bf16 QKV (softmax
    scale folded into the Q columns), stacked per-layer slabs, (1, X) biases."""
    D = cfg.hidden_size
    I = cfg.intermediate_size
    nh = cfg.num_attention_heads
    hd = D // nh
    scale = hd ** -0.5
    bf = jnp.bfloat16

    ln1_g, ln1_b, qkv_w, qkv_b, o_w, o_b = [], [], [], [], [], []
    ln2_g, ln2_b, fc1_w, fc1_b, fc2_w, fc2_b = [], [], [], [], [], []
    for lp in params["layers"]:
        ln1_g.append(lp["ln1_g"].reshape(1, D))
        ln1_b.append(lp["ln1_b"].reshape(1, D))
        qkv_w.append(jnp.concatenate(
            [lp["q_w"].T * scale, lp["k_w"].T, lp["v_w"].T], axis=1).astype(bf))
        qkv_b.append(jnp.concatenate(
            [lp["q_b"] * scale, lp["k_b"], lp["v_b"]]).reshape(1, 3 * D))
        o_w.append(lp["o_w"].T.astype(bf))
        o_b.append(lp["o_b"].reshape(1, D))
        ln2_g.append(lp["ln2_g"].reshape(1, D))
        ln2_b.append(lp["ln2_b"].reshape(1, D))
        fc1_w.append(lp["fc1_w"].T.astype(bf))
        fc1_b.append(lp["fc1_b"].reshape(1, I))
        fc2_w.append(lp["fc2_w"].T.astype(bf))
        fc2_b.append(lp["fc2_b"].reshape(1, D))

    return {
        "patch_w": params["patch_w"].reshape(D, -1).T.astype(bf),   # (C*P*P, D)
        "patch_b": params["patch_b"].reshape(1, D),
        "pos_emb": params["pos_emb"],
        "ln_g": params["ln_g"].reshape(1, D),
        "ln_b": params["ln_b"].reshape(1, D),
        "ln1_g": jnp.stack(ln1_g), "ln1_b": jnp.stack(ln1_b),
        "qkv_w": jnp.stack(qkv_w), "qkv_b": jnp.stack(qkv_b),
        "o_w": jnp.stack(o_w), "o_b": jnp.stack(o_b),
        "ln2_g": jnp.stack(ln2_g), "ln2_b": jnp.stack(ln2_b),
        "fc1_w": jnp.stack(fc1_w), "fc1_b": jnp.stack(fc1_b),
        "fc2_w": jnp.stack(fc2_w), "fc2_b": jnp.stack(fc2_b),
    }


def siglip_vision_model(x, params, cfg):
    B, C, H, W = x.shape
    P = cfg.patch_size
    nH, nW = H // P, W // P
    N = nH * nW

    # Patch-extract (stride==kernel conv as matmul). Under jit this reshape /
    # transpose is fused by XLA into the feed of the fused model kernel.
    # TODO(synk): at production image sizes, fold this into the embed BlockSpec
    # index_map over (nH, nW) patch blocks to avoid an HBM transpose copy.
    patches = (
        x.reshape(B, C, nH, P, nW, P)
        .transpose(0, 2, 4, 1, 3, 5)
        .reshape(B, N, C * P * P)
    )
    return siglip_forward(patches, params, cfg)


# ----------------------------- main -------------------------------------------
if __name__ == "__main__":
    cfg = Config()
    key = jax.random.PRNGKey(0)
    pkey, xkey = jax.random.split(key)

    params = prepare_params(init_params(pkey, cfg), cfg)
    x = jax.random.normal(
        xkey, (2, cfg.num_channels, cfg.image_size, cfg.image_size), jnp.float32
    )

    fwd = jax.jit(functools.partial(siglip_vision_model, cfg=cfg))
    out = jax.block_until_ready(fwd(x, params))

    expected_seq = (cfg.image_size // cfg.patch_size) ** 2
    assert out.shape == (2, expected_seq, cfg.hidden_size), out.shape
    assert out.dtype == jnp.float32
    print("KERNEL_OK")
</pallas_src>

<mosaic_0001>
module attributes {stable_mosaic.version = 11 : i64} {
  func.func @_model_kernel(%arg0: i32, %arg1: memref<1x4x192xf32, #tpu.memory_space<vmem>>, %arg2: memref<192x32xbf16, #tpu.memory_space<vmem>>, %arg3: memref<1x32xf32, #tpu.memory_space<vmem>>, %arg4: memref<4x32xf32, #tpu.memory_space<vmem>>, %arg5: memref<2x1x32xf32, #tpu.memory_space<vmem>>, %arg6: memref<2x1x32xf32, #tpu.memory_space<vmem>>, %arg7: memref<2x32x96xbf16, #tpu.memory_space<vmem>>, %arg8: memref<2x1x96xf32, #tpu.memory_space<vmem>>, %arg9: memref<2x32x32xbf16, #tpu.memory_space<vmem>>, %arg10: memref<2x1x32xf32, #tpu.memory_space<vmem>>, %arg11: memref<2x1x32xf32, #tpu.memory_space<vmem>>, %arg12: memref<2x1x32xf32, #tpu.memory_space<vmem>>, %arg13: memref<2x32x64xbf16, #tpu.memory_space<vmem>>, %arg14: memref<2x1x64xf32, #tpu.memory_space<vmem>>, %arg15: memref<2x64x32xbf16, #tpu.memory_space<vmem>>, %arg16: memref<2x1x32xf32, #tpu.memory_space<vmem>>, %arg17: memref<1x32xf32, #tpu.memory_space<vmem>>, %arg18: memref<1x32xf32, #tpu.memory_space<vmem>>, %arg19: memref<1x4x32xf32, #tpu.memory_space<vmem>>) attributes {dimension_semantics = [#tpu.dimension_semantics<parallel>], iteration_bounds = array<i64: 2>, scalar_prefetch = 0 : i64, scratch_operands = 0 : i64, tpu.core_type = #tpu.core_type<tc>, window_params = [{transform_indices = @transform_0, window_bounds = array<i64: 1, 4, 192>}, {pipeline_mode = #tpu.pipeline_mode<synchronous>, transform_indices = @transform_1, window_bounds = array<i64: 192, 32>}, {pipeline_mode = #tpu.pipeline_mode<synchronous>, transform_indices = @transform_2, window_bounds = array<i64: 1, 32>}, {pipeline_mode = #tpu.pipeline_mode<synchronous>, transform_indices = @transform_3, window_bounds = array<i64: 4, 32>}, {pipeline_mode = #tpu.pipeline_mode<synchronous>, transform_indices = @transform_4, window_bounds = array<i64: 2, 1, 32>}, {pipeline_mode = #tpu.pipeline_mode<synchronous>, transform_indices = @transform_5, window_bounds = array<i64: 2, 1, 32>}, {pipeline_mode = #tpu.pipeline_mode<synchronous>, transform_indices = @transform_6, window_bounds = array<i64: 2, 32, 96>}, {pipeline_mode = #tpu.pipeline_mode<synchronous>, transform_indices = @transform_7, window_bounds = array<i64: 2, 1, 96>}, {pipeline_mode = #tpu.pipeline_mode<synchronous>, transform_indices = @transform_8, window_bounds = array<i64: 2, 32, 32>}, {pipeline_mode = #tpu.pipeline_mode<synchronous>, transform_indices = @transform_9, window_bounds = array<i64: 2, 1, 32>}, {pipeline_mode = #tpu.pipeline_mode<synchronous>, transform_indices = @transform_10, window_bounds = array<i64: 2, 1, 32>}, {pipeline_mode = #tpu.pipeline_mode<synchronous>, transform_indices = @transform_11, window_bounds = array<i64: 2, 1, 32>}, {pipeline_mode = #tpu.pipeline_mode<synchronous>, transform_indices = @transform_12, window_bounds = array<i64: 2, 32, 64>}, {pipeline_mode = #tpu.pipeline_mode<synchronous>, transform_indices = @transform_13, window_bounds = array<i64: 2, 1, 64>}, {pipeline_mode = #tpu.pipeline_mode<synchronous>, transform_indices = @transform_14, window_bounds = array<i64: 2, 64, 32>}, {pipeline_mode = #tpu.pipeline_mode<synchronous>, transform_indices = @transform_15, window_bounds = array<i64: 2, 1, 32>}, {pipeline_mode = #tpu.pipeline_mode<synchronous>, transform_indices = @transform_16, window_bounds = array<i64: 1, 32>}, {pipeline_mode = #tpu.pipeline_mode<synchronous>, transform_indices = @transform_17, window_bounds = array<i64: 1, 32>}, {transform_indices = @transform_18, window_bounds = array<i64: 1, 4, 32>}]} {
    %c0 = arith.constant 0 : index
    %c0_0 = arith.constant 0 : index
    %c0_1 = arith.constant 0 : index
    %0 = vector.load %arg1[%c0, %c0_0, %c0_1] : memref<1x4x192xf32, #tpu.memory_space<vmem>>, vector<1x4x192xf32>
    %1 = vector.shape_cast %0 : vector<1x4x192xf32> to vector<4x192xf32>
    %2 = arith.truncf %1 : vector<4x192xf32> to vector<4x192xbf16>
    %c0_2 = arith.constant 0 : index
    %c0_3 = arith.constant 0 : index
    %3 = vector.load %arg2[%c0_2, %c0_3] : memref<192x32xbf16, #tpu.memory_space<vmem>>, vector<192x32xbf16>
    %cst = arith.constant dense<0.000000e+00> : vector<4x32xf32>
    %4 = tpu.matmul %2, %3, %cst {dimension_numbers = #tpu.dot_dimension_numbers<[1], [0], [0], [1], [0, 0, 1, 1], [], []>} : vector<4x192xbf16>, vector<192x32xbf16>, vector<4x32xf32> -> vector<4x32xf32>
    %c0_4 = arith.constant 0 : index
    %c0_5 = arith.constant 0 : index
    %5 = vector.load %arg3[%c0_4, %c0_5] : memref<1x32xf32, #tpu.memory_space<vmem>>, vector<1x32xf32>
    %6 = vector.broadcast %5 : vector<1x32xf32> to vector<4x32xf32>
    %7 = arith.addf %4, %6 : vector<4x32xf32>
    %c0_6 = arith.constant 0 : index
    %c0_7 = arith.constant 0 : index
    %8 = vector.load %arg4[%c0_6, %c0_7] : memref<4x32xf32, #tpu.memory_space<vmem>>, vector<4x32xf32>
    %9 = arith.addf %7, %8 : vector<4x32xf32>
    %c0_8 = arith.constant 0 : index
    %c0_9 = arith.constant 0 : index
    %c0_10 = arith.constant 0 : index
    %10 = vector.load %arg5[%c0_8, %c0_9, %c0_10] : memref<2x1x32xf32, #tpu.memory_space<vmem>>, vector<1x1x32xf32>
    %11 = vector.shape_cast %10 : vector<1x1x32xf32> to vector<1x32xf32>
    %c0_11 = arith.constant 0 : index
    %c0_12 = arith.constant 0 : index
    %c0_13 = arith.constant 0 : index
    %12 = vector.load %arg6[%c0_11, %c0_12, %c0_13] : memref<2x1x32xf32, #tpu.memory_space<vmem>>, vector<1x1x32xf32>
    %13 = vector.shape_cast %12 : vector<1x1x32xf32> to vector<1x32xf32>
    %cst_14 = arith.constant dense<0.000000e+00> : vector<4xf32>
    %14 = vector.multi_reduction <add>, %9, %cst_14 [1] : vector<4x32xf32> to vector<4xf32>
    %15 = vector.shape_cast %14 : vector<4xf32> to vector<4x1xf32>
    %cst_15 = arith.constant 3.200000e+01 : f32
    %16 = vector.broadcast %cst_15 : f32 to vector<4x1xf32>
    %17 = arith.divf %15, %16 : vector<4x1xf32>
    %18 = vector.broadcast %17 : vector<4x1xf32> to vector<4x32xf32>
    %19 = arith.subf %9, %18 : vector<4x32xf32>
    %20 = arith.mulf %19, %19 : vector<4x32xf32>
    %cst_16 = arith.constant dense<0.000000e+00> : vector<4xf32>
    %21 = vector.multi_reduction <add>, %20, %cst_16 [1] : vector<4x32xf32> to vector<4xf32>
    %22 = vector.shape_cast %21 : vector<4xf32> to vector<4x1xf32>
    %cst_17 = arith.constant 3.200000e+01 : f32
    %23 = vector.broadcast %cst_17 : f32 to vector<4x1xf32>
    %24 = arith.divf %22, %23 : vector<4x1xf32>
    %25 = vector.broadcast %17 : vector<4x1xf32> to vector<4x32xf32>
    %26 = arith.subf %9, %25 : vector<4x32xf32>
    %cst_18 = arith.constant 9.99999997E-7 : f32
    %27 = vector.broadcast %cst_18 : f32 to vector<4x1xf32>
    %28 = arith.addf %24, %27 : vector<4x1xf32>
    %29 = math.rsqrt %28 : vector<4x1xf32>
    %30 = vector.broadcast %29 : vector<4x1xf32> to vector<4x32xf32>
    %31 = arith.mulf %26, %30 : vector<4x32xf32>
    %32 = vector.broadcast %11 : vector<1x32xf32> to vector<4x32xf32>
    %33 = arith.mulf %31, %32 : vector<4x32xf32>
    %34 = vector.broadcast %13 : vector<1x32xf32> to vector<4x32xf32>
    %35 = arith.addf %33, %34 : vector<4x32xf32>
    %36 = arith.truncf %35 : vector<4x32xf32> to vector<4x32xbf16>
    %c0_19 = arith.constant 0 : index
    %c0_20 = arith.constant 0 : index
    %c0_21 = arith.constant 0 : index
    %37 = vector.load %arg7[%c0_19, %c0_20, %c0_21] : memref<2x32x96xbf16, #tpu.memory_space<vmem>>, vector<1x32x96xbf16>
    %38 = vector.shape_cast %37 : vector<1x32x96xbf16> to vector<32x96xbf16>
    %cst_22 = arith.constant dense<0.000000e+00> : vector<4x96xf32>
    %39 = tpu.matmul %36, %38, %cst_22 {dimension_numbers = #tpu.dot_dimension_numbers<[1], [0], [0], [1], [0, 0, 1, 1], [], []>} : vector<4x32xbf16>, vector<32x96xbf16>, vector<4x96xf32> -> vector<4x96xf32>
    %c0_23 = arith.constant 0 : index
    %c0_24 = arith.constant 0 : index
    %c0_25 = arith.constant 0 : index
    %40 = vector.load %arg8[%c0_23, %c0_24, %c0_25] : memref<2x1x96xf32, #tpu.memory_space<vmem>>, vector<1x1x96xf32>
    %41 = vector.shape_cast %40 : vector<1x1x96xf32> to vector<1x96xf32>
    %42 = vector.broadcast %41 : vector<1x96xf32> to vector<4x96xf32>
    %43 = arith.addf %39, %42 : vector<4x96xf32>
    %44 = vector.extract_strided_slice %43 {offsets = [0, 0], sizes = [4, 8], strides = [1, 1]} : vector<4x96xf32> to vector<4x8xf32>
    %45 = arith.truncf %44 : vector<4x8xf32> to vector<4x8xbf16>
    %46 = vector.extract_strided_slice %43 {offsets = [0, 32], sizes = [4, 8], strides = [1, 1]} : vector<4x96xf32> to vector<4x8xf32>
    %47 = arith.truncf %46 : vector<4x8xf32> to vector<4x8xbf16>
    %48 = vector.extract_strided_slice %43 {offsets = [0, 64], sizes = [4, 8], strides = [1, 1]} : vector<4x96xf32> to vector<4x8xf32>
    %49 = arith.truncf %48 : vector<4x8xf32> to vector<4x8xbf16>
    %cst_26 = arith.constant dense<0.000000e+00> : vector<4x4xf32>
    %50 = tpu.matmul %45, %47, %cst_26 {dimension_numbers = #tpu.dot_dimension_numbers<[1], [1], [0], [0], [0, 0, 1, 0], [], []>} : vector<4x8xbf16>, vector<4x8xbf16>, vector<4x4xf32> -> vector<4x4xf32>
    %cst_27 = arith.constant dense<0xFF800000> : vector<4xf32>
    %51 = vector.multi_reduction <maximumf>, %50, %cst_27 [1] : vector<4x4xf32> to vector<4xf32>
    %52 = vector.shape_cast %51 : vector<4xf32> to vector<4x1xf32>
    %53 = vector.broadcast %52 : vector<4x1xf32> to vector<4x4xf32>
    %54 = arith.subf %50, %53 : vector<4x4xf32>
    %55 = math.exp %54 : vector<4x4xf32>
    %cst_28 = arith.constant dense<0.000000e+00> : vector<4xf32>
    %56 = vector.multi_reduction <add>, %55, %cst_28 [1] : vector<4x4xf32> to vector<4xf32>
    %57 = vector.shape_cast %56 : vector<4xf32> to vector<4x1xf32>
    %58 = vector.broadcast %57 : vector<4x1xf32> to vector<4x4xf32>
    %59 = arith.divf %55, %58 : vector<4x4xf32>
    %60 = arith.truncf %59 : vector<4x4xf32> to vector<4x4xbf16>
    %cst_29 = arith.constant dense<0.000000e+00> : vector<4x8xf32>
    %61 = tpu.matmul %60, %49, %cst_29 {dimension_numbers = #tpu.dot_dimension_numbers<[1], [0], [0], [1], [0, 0, 1, 1], [], []>} : vector<4x4xbf16>, vector<4x8xbf16>, vector<4x8xf32> -> vector<4x8xf32>
    %62 = vector.extract_strided_slice %43 {offsets = [0, 8], sizes = [4, 8], strides = [1, 1]} : vector<4x96xf32> to vector<4x8xf32>
    %63 = arith.truncf %62 : vector<4x8xf32> to vector<4x8xbf16>
    %64 = vector.extract_strided_slice %43 {offsets = [0, 40], sizes = [4, 8], strides = [1, 1]} : vector<4x96xf32> to vector<4x8xf32>
    %65 = arith.truncf %64 : vector<4x8xf32> to vector<4x8xbf16>
    %66 = vector.extract_strided_slice %43 {offsets = [0, 72], sizes = [4, 8], strides = [1, 1]} : vector<4x96xf32> to vector<4x8xf32>
    %67 = arith.truncf %66 : vector<4x8xf32> to vector<4x8xbf16>
    %cst_30 = arith.constant dense<0.000000e+00> : vector<4x4xf32>
    %68 = tpu.matmul %63, %65, %cst_30 {dimension_numbers = #tpu.dot_dimension_numbers<[1], [1], [0], [0], [0, 0, 1, 0], [], []>} : vector<4x8xbf16>, vector<4x8xbf16>, vector<4x4xf32> -> vector<4x4xf32>
    %cst_31 = arith.constant dense<0xFF800000> : vector<4xf32>
    %69 = vector.multi_reduction <maximumf>, %68, %cst_31 [1] : vector<4x4xf32> to vector<4xf32>
    %70 = vector.shape_cast %69 : vector<4xf32> to vector<4x1xf32>
    %71 = vector.broadcast %70 : vector<4x1xf32> to vector<4x4xf32>
    %72 = arith.subf %68, %71 : vector<4x4xf32>
    %73 = math.exp %72 : vector<4x4xf32>
    %cst_32 = arith.constant dense<0.000000e+00> : vector<4xf32>
    %74 = vector.multi_reduction <add>, %73, %cst_32 [1] : vector<4x4xf32> to vector<4xf32>
    %75 = vector.shape_cast %74 : vector<4xf32> to vector<4x1xf32>
    %76 = vector.broadcast %75 : vector<4x1xf32> to vector<4x4xf32>
    %77 = arith.divf %73, %76 : vector<4x4xf32>
    %78 = arith.truncf %77 : vector<4x4xf32> to vector<4x4xbf16>
    %cst_33 = arith.constant dense<0.000000e+00> : vector<4x8xf32>
    %79 = tpu.matmul %78, %67, %cst_33 {dimension_numbers = #tpu.dot_dimension_numbers<[1], [0], [0], [1], [0, 0, 1, 1], [], []>} : vector<4x4xbf16>, vector<4x8xbf16>, vector<4x8xf32> -> vector<4x8xf32>
    %80 = vector.extract_strided_slice %43 {offsets = [0, 16], sizes = [4, 8], strides = [1, 1]} : vector<4x96xf32> to vector<4x8xf32>
    %81 = arith.truncf %80 : vector<4x8xf32> to vector<4x8xbf16>
    %82 = vector.extract_strided_slice %43 {offsets = [0, 48], sizes = [4, 8], strides = [1, 1]} : vector<4x96xf32> to vector<4x8xf32>
    %83 = arith.truncf %82 : vector<4x8xf32> to vector<4x8xbf16>
    %84 = vector.extract_strided_slice %43 {offsets = [0, 80], sizes = [4, 8], strides = [1, 1]} : vector<4x96xf32> to vector<4x8xf32>
    %85 = arith.truncf %84 : vector<4x8xf32> to vector<4x8xbf16>
    %cst_34 = arith.constant dense<0.000000e+00> : vector<4x4xf32>
    %86 = tpu.matmul %81, %83, %cst_34 {dimension_numbers = #tpu.dot_dimension_numbers<[1], [1], [0], [0], [0, 0, 1, 0], [], []>} : vector<4x8xbf16>, vector<4x8xbf16>, vector<4x4xf32> -> vector<4x4xf32>
    %cst_35 = arith.constant dense<0xFF800000> : vector<4xf32>
    %87 = vector.multi_reduction <maximumf>, %86, %cst_35 [1] : vector<4x4xf32> to vector<4xf32>
    %88 = vector.shape_cast %87 : vector<4xf32> to vector<4x1xf32>
    %89 = vector.broadcast %88 : vector<4x1xf32> to vector<4x4xf32>
    %90 = arith.subf %86, %89 : vector<4x4xf32>
    %91 = math.exp %90 : vector<4x4xf32>
    %cst_36 = arith.constant dense<0.000000e+00> : vector<4xf32>
    %92 = vector.multi_reduction <add>, %91, %cst_36 [1] : vector<4x4xf32> to vector<4xf32>
    %93 = vector.shape_cast %92 : vector<4xf32> to vector<4x1xf32>
    %94 = vector.broadcast %93 : vector<4x1xf32> to vector<4x4xf32>
    %95 = arith.divf %91, %94 : vector<4x4xf32>
    %96 = arith.truncf %95 : vector<4x4xf32> to vector<4x4xbf16>
    %cst_37 = arith.constant dense<0.000000e+00> : vector<4x8xf32>
    %97 = tpu.matmul %96, %85, %cst_37 {dimension_numbers = #tpu.dot_dimension_numbers<[1], [0], [0], [1], [0, 0, 1, 1], [], []>} : vector<4x4xbf16>, vector<4x8xbf16>, vector<4x8xf32> -> vector<4x8xf32>
    %98 = vector.extract_strided_slice %43 {offsets = [0, 24], sizes = [4, 8], strides = [1, 1]} : vector<4x96xf32> to vector<4x8xf32>
    %99 = arith.truncf %98 : vector<4x8xf32> to vector<4x8xbf16>
    %100 = vector.extract_strided_slice %43 {offsets = [0, 56], sizes = [4, 8], strides = [1, 1]} : vector<4x96xf32> to vector<4x8xf32>
    %101 = arith.truncf %100 : vector<4x8xf32> to vector<4x8xbf16>
    %102 = vector.extract_strided_slice %43 {offsets = [0, 88], sizes = [4, 8], strides = [1, 1]} : vector<4x96xf32> to vector<4x8xf32>
    %103 = arith.truncf %102 : vector<4x8xf32> to vector<4x8xbf16>
    %cst_38 = arith.constant dense<0.000000e+00> : vector<4x4xf32>
    %104 = tpu.matmul %99, %101, %cst_38 {dimension_numbers = #tpu.dot_dimension_numbers<[1], [1], [0], [0], [0, 0, 1, 0], [], []>} : vector<4x8xbf16>, vector<4x8xbf16>, vector<4x4xf32> -> vector<4x4xf32>
    %cst_39 = arith.constant dense<0xFF800000> : vector<4xf32>
    %105 = vector.multi_reduction <maximumf>, %104, %cst_39 [1] : vector<4x4xf32> to vector<4xf32>
    %106 = vector.shape_cast %105 : vector<4xf32> to vector<4x1xf32>
    %107 = vector.broadcast %106 : vector<4x1xf32> to vector<4x4xf32>
    %108 = arith.subf %104, %107 : vector<4x4xf32>
    %109 = math.exp %108 : vector<4x4xf32>
    %cst_40 = arith.constant dense<0.000000e+00> : vector<4xf32>
    %110 = vector.multi_reduction <add>, %109, %cst_40 [1] : vector<4x4xf32> to vector<4xf32>
    %111 = vector.shape_cast %110 : vector<4xf32> to vector<4x1xf32>
    %112 = vector.broadcast %111 : vector<4x1xf32> to vector<4x4xf32>
    %113 = arith.divf %109, %112 : vector<4x4xf32>
    %114 = arith.truncf %113 : vector<4x4xf32> to vector<4x4xbf16>
    %cst_41 = arith.constant dense<0.000000e+00> : vector<4x8xf32>
    %115 = tpu.matmul %114, %103, %cst_41 {dimension_numbers = #tpu.dot_dimension_numbers<[1], [0], [0], [1], [0, 0, 1, 1], [], []>} : vector<4x4xbf16>, vector<4x8xbf16>, vector<4x8xf32> -> vector<4x8xf32>
    %116 = tpu.concatenate %61, %79, %97, %115 in 1 : vector<4x8xf32>, vector<4x8xf32>, vector<4x8xf32>, vector<4x8xf32> -> vector<4x32xf32>
    %117 = arith.truncf %116 : vector<4x32xf32> to vector<4x32xbf16>
    %c0_42 = arith.constant 0 : index
    %c0_43 = arith.constant 0 : index
    %c0_44 = arith.constant 0 : index
    %118 = vector.load %arg9[%c0_42, %c0_43, %c0_44] : memref<2x32x32xbf16, #tpu.memory_space<vmem>>, vector<1x32x32xbf16>
    %119 = vector.shape_cast %118 : vector<1x32x32xbf16> to vector<32x32xbf16>
    %cst_45 = arith.constant dense<0.000000e+00> : vector<4x32xf32>
    %120 = tpu.matmul %117, %119, %cst_45 {dimension_numbers = #tpu.dot_dimension_numbers<[1], [0], [0], [1], [0, 0, 1, 1], [], []>} : vector<4x32xbf16>, vector<32x32xbf16>, vector<4x32xf32> -> vector<4x32xf32>
    %c0_46 = arith.constant 0 : index
    %c0_47 = arith.constant 0 : index
    %c0_48 = arith.constant 0 : index
    %121 = vector.load %arg10[%c0_46, %c0_47, %c0_48] : memref<2x1x32xf32, #tpu.memory_space<vmem>>, vector<1x1x32xf32>
    %122 = vector.shape_cast %121 : vector<1x1x32xf32> to vector<1x32xf32>
    %123 = vector.broadcast %122 : vector<1x32xf32> to vector<4x32xf32>
    %124 = arith.addf %120, %123 : vector<4x32xf32>
    %125 = arith.addf %9, %124 : vector<4x32xf32>
    %c0_49 = arith.constant 0 : index
    %c0_50 = arith.constant 0 : index
    %c0_51 = arith.constant 0 : index
    %126 = vector.load %arg11[%c0_49, %c0_50, %c0_51] : memref<2x1x32xf32, #tpu.memory_space<vmem>>, vector<1x1x32xf32>
    %127 = vector.shape_cast %126 : vector<1x1x32xf32> to vector<1x32xf32>
    %c0_52 = arith.constant 0 : index
    %c0_53 = arith.constant 0 : index
    %c0_54 = arith.constant 0 : index
    %128 = vector.load %arg12[%c0_52, %c0_53, %c0_54] : memref<2x1x32xf32, #tpu.memory_space<vmem>>, vector<1x1x32xf32>
    %129 = vector.shape_cast %128 : vector<1x1x32xf32> to vector<1x32xf32>
    %cst_55 = arith.constant dense<0.000000e+00> : vector<4xf32>
    %130 = vector.multi_reduction <add>, %125, %cst_55 [1] : vector<4x32xf32> to vector<4xf32>
    %131 = vector.shape_cast %130 : vector<4xf32> to vector<4x1xf32>
    %cst_56 = arith.constant 3.200000e+01 : f32
    %132 = vector.broadcast %cst_56 : f32 to vector<4x1xf32>
    %133 = arith.divf %131, %132 : vector<4x1xf32>
    %134 = vector.broadcast %133 : vector<4x1xf32> to vector<4x32xf32>
    %135 = arith.subf %125, %134 : vector<4x32xf32>
    %136 = arith.mulf %135, %135 : vector<4x32xf32>
    %cst_57 = arith.constant dense<0.000000e+00> : vector<4xf32>
    %137 = vector.multi_reduction <add>, %136, %cst_57 [1] : vector<4x32xf32> to vector<4xf32>
    %138 = vector.shape_cast %137 : vector<4xf32> to vector<4x1xf32>
    %cst_58 = arith.constant 3.200000e+01 : f32
    %139 = vector.broadcast %cst_58 : f32 to vector<4x1xf32>
    %140 = arith.divf %138, %139 : vector<4x1xf32>
    %141 = vector.broadcast %133 : vector<4x1xf32> to vector<4x32xf32>
    %142 = arith.subf %125, %141 : vector<4x32xf32>
    %cst_59 = arith.constant 9.99999997E-7 : f32
    %143 = vector.broadcast %cst_59 : f32 to vector<4x1xf32>
    %144 = arith.addf %140, %143 : vector<4x1xf32>
    %145 = math.rsqrt %144 : vector<4x1xf32>
    %146 = vector.broadcast %145 : vector<4x1xf32> to vector<4x32xf32>
    %147 = arith.mulf %142, %146 : vector<4x32xf32>
    %148 = vector.broadcast %127 : vector<1x32xf32> to vector<4x32xf32>
    %149 = arith.mulf %147, %148 : vector<4x32xf32>
    %150 = vector.broadcast %129 : vector<1x32xf32> to vector<4x32xf32>
    %151 = arith.addf %149, %150 : vector<4x32xf32>
    %152 = arith.truncf %151 : vector<4x32xf32> to vector<4x32xbf16>
    %c0_60 = arith.constant 0 : index
    %c0_61 = arith.constant 0 : index
    %c0_62 = arith.constant 0 : index
    %153 = vector.load %arg13[%c0_60, %c0_61, %c0_62] : memref<2x32x64xbf16, #tpu.memory_space<vmem>>, vector<1x32x64xbf16>
    %154 = vector.shape_cast %153 : vector<1x32x64xbf16> to vector<32x64xbf16>
    %cst_63 = arith.constant dense<0.000000e+00> : vector<4x64xf32>
    %155 = tpu.matmul %152, %154, %cst_63 {dimension_numbers = #tpu.dot_dimension_numbers<[1], [0], [0], [1], [0, 0, 1, 1], [], []>} : vector<4x32xbf16>, vector<32x64xbf16>, vector<4x64xf32> -> vector<4x64xf32>
    %c0_64 = arith.constant 0 : index
    %c0_65 = arith.constant 0 : index
    %c0_66 = arith.constant 0 : index
    %156 = vector.load %arg14[%c0_64, %c0_65, %c0_66] : memref<2x1x64xf32, #tpu.memory_space<vmem>>, vector<1x1x64xf32>
    %157 = vector.shape_cast %156 : vector<1x1x64xf32> to vector<1x64xf32>
    %158 = vector.broadcast %157 : vector<1x64xf32> to vector<4x64xf32>
    %159 = arith.addf %155, %158 : vector<4x64xf32>
    %cst_67 = arith.constant 5.000000e-01 : f32
    %160 = vector.broadcast %cst_67 : f32 to vector<4x64xf32>
    %161 = arith.mulf %160, %159 : vector<4x64xf32>
    %cst_68 = arith.constant 4.471500e-02 : f32
    %162 = vector.broadcast %cst_68 : f32 to vector<4x64xf32>
    %163 = arith.mulf %162, %159 : vector<4x64xf32>
    %164 = arith.mulf %163, %159 : vector<4x64xf32>
    %165 = arith.mulf %164, %159 : vector<4x64xf32>
    %166 = arith.addf %159, %165 : vector<4x64xf32>
    %cst_69 = arith.constant 0.797884583 : f32
    %167 = vector.broadcast %cst_69 : f32 to vector<4x64xf32>
    %168 = arith.mulf %167, %166 : vector<4x64xf32>
    %169 = math.tanh %168 : vector<4x64xf32>
    %cst_70 = arith.constant 1.000000e+00 : f32
    %170 = vector.broadcast %cst_70 : f32 to vector<4x64xf32>
    %171 = arith.addf %170, %169 : vector<4x64xf32>
    %172 = arith.mulf %161, %171 : vector<4x64xf32>
    %173 = arith.truncf %172 : vector<4x64xf32> to vector<4x64xbf16>
    %c0_71 = arith.constant 0 : index
    %c0_72 = arith.constant 0 : index
    %c0_73 = arith.constant 0 : index
    %174 = vector.load %arg15[%c0_71, %c0_72, %c0_73] : memref<2x64x32xbf16, #tpu.memory_space<vmem>>, vector<1x64x32xbf16>
    %175 = vector.shape_cast %174 : vector<1x64x32xbf16> to vector<64x32xbf16>
    %cst_74 = arith.constant dense<0.000000e+00> : vector<4x32xf32>
    %176 = tpu.matmul %173, %175, %cst_74 {dimension_numbers = #tpu.dot_dimension_numbers<[1], [0], [0], [1], [0, 0, 1, 1], [], []>} : vector<4x64xbf16>, vector<64x32xbf16>, vector<4x32xf32> -> vector<4x32xf32>
    %c0_75 = arith.constant 0 : index
    %c0_76 = arith.constant 0 : index
    %c0_77 = arith.constant 0 : index
    %177 = vector.load %arg16[%c0_75, %c0_76, %c0_77] : memref<2x1x32xf32, #tpu.memory_space<vmem>>, vector<1x1x32xf32>
    %178 = vector.shape_cast %177 : vector<1x1x32xf32> to vector<1x32xf32>
    %179 = vector.broadcast %178 : vector<1x32xf32> to vector<4x32xf32>
    %180 = arith.addf %176, %179 : vector<4x32xf32>
    %181 = arith.addf %125, %180 : vector<4x32xf32>
    %c1 = arith.constant 1 : index
    %c0_78 = arith.constant 0 : index
    %c0_79 = arith.constant 0 : index
    %182 = vector.load %arg5[%c1, %c0_78, %c0_79] : memref<2x1x32xf32, #tpu.memory_space<vmem>>, vector<1x1x32xf32>
    %183 = vector.shape_cast %182 : vector<1x1x32xf32> to vector<1x32xf32>
    %c1_80 = arith.constant 1 : index
    %c0_81 = arith.constant 0 : index
    %c0_82 = arith.constant 0 : index
    %184 = vector.load %arg6[%c1_80, %c0_81, %c0_82] : memref<2x1x32xf32, #tpu.memory_space<vmem>>, vector<1x1x32xf32>
    %185 = vector.shape_cast %184 : vector<1x1x32xf32> to vector<1x32xf32>
    %cst_83 = arith.constant dense<0.000000e+00> : vector<4xf32>
    %186 = vector.multi_reduction <add>, %181, %cst_83 [1] : vector<4x32xf32> to vector<4xf32>
    %187 = vector.shape_cast %186 : vector<4xf32> to vector<4x1xf32>
    %cst_84 = arith.constant 3.200000e+01 : f32
    %188 = vector.broadcast %cst_84 : f32 to vector<4x1xf32>
    %189 = arith.divf %187, %188 : vector<4x1xf32>
    %190 = vector.broadcast %189 : vector<4x1xf32> to vector<4x32xf32>
    %191 = arith.subf %181, %190 : vector<4x32xf32>
    %192 = arith.mulf %191, %191 : vector<4x32xf32>
    %cst_85 = arith.constant dense<0.000000e+00> : vector<4xf32>
    %193 = vector.multi_reduction <add>, %192, %cst_85 [1] : vector<4x32xf32> to vector<4xf32>
    %194 = vector.shape_cast %193 : vector<4xf32> to vector<4x1xf32>
    %cst_86 = arith.constant 3.200000e+01 : f32
    %195 = vector.broadcast %cst_86 : f32 to vector<4x1xf32>
    %196 = arith.divf %194, %195 : vector<4x1xf32>
    %197 = vector.broadcast %189 : vector<4x1xf32> to vector<4x32xf32>
    %198 = arith.subf %181, %197 : vector<4x32xf32>
    %cst_87 = arith.constant 9.99999997E-7 : f32
    %199 = vector.broadcast %cst_87 : f32 to vector<4x1xf32>
    %200 = arith.addf %196, %199 : vector<4x1xf32>
    %201 = math.rsqrt %200 : vector<4x1xf32>
    %202 = vector.broadcast %201 : vector<4x1xf32> to vector<4x32xf32>
    %203 = arith.mulf %198, %202 : vector<4x32xf32>
    %204 = vector.broadcast %183 : vector<1x32xf32> to vector<4x32xf32>
    %205 = arith.mulf %203, %204 : vector<4x32xf32>
    %206 = vector.broadcast %185 : vector<1x32xf32> to vector<4x32xf32>
    %207 = arith.addf %205, %206 : vector<4x32xf32>
    %208 = arith.truncf %207 : vector<4x32xf32> to vector<4x32xbf16>
    %c1_88 = arith.constant 1 : index
    %c0_89 = arith.constant 0 : index
    %c0_90 = arith.constant 0 : index
    %209 = vector.load %arg7[%c1_88, %c0_89, %c0_90] : memref<2x32x96xbf16, #tpu.memory_space<vmem>>, vector<1x32x96xbf16>
    %210 = vector.shape_cast %209 : vector<1x32x96xbf16> to vector<32x96xbf16>
    %cst_91 = arith.constant dense<0.000000e+00> : vector<4x96xf32>
    %211 = tpu.matmul %208, %210, %cst_91 {dimension_numbers = #tpu.dot_dimension_numbers<[1], [0], [0], [1], [0, 0, 1, 1], [], []>} : vector<4x32xbf16>, vector<32x96xbf16>, vector<4x96xf32> -> vector<4x96xf32>
    %c1_92 = arith.constant 1 : index
    %c0_93 = arith.constant 0 : index
    %c0_94 = arith.constant 0 : index
    %212 = vector.load %arg8[%c1_92, %c0_93, %c0_94] : memref<2x1x96xf32, #tpu.memory_space<vmem>>, vector<1x1x96xf32>
    %213 = vector.shape_cast %212 : vector<1x1x96xf32> to vector<1x96xf32>
    %214 = vector.broadcast %213 : vector<1x96xf32> to vector<4x96xf32>
    %215 = arith.addf %211, %214 : vector<4x96xf32>
    %216 = vector.extract_strided_slice %215 {offsets = [0, 0], sizes = [4, 8], strides = [1, 1]} : vector<4x96xf32> to vector<4x8xf32>
    %217 = arith.truncf %216 : vector<4x8xf32> to vector<4x8xbf16>
    %218 = vector.extract_strided_slice %215 {offsets = [0, 32], sizes = [4, 8], strides = [1, 1]} : vector<4x96xf32> to vector<4x8xf32>
    %219 = arith.truncf %218 : vector<4x8xf32> to vector<4x8xbf16>
    %220 = vector.extract_strided_slice %215 {offsets = [0, 64], sizes = [4, 8], strides = [1, 1]} : vector<4x96xf32> to vector<4x8xf32>
    %221 = arith.truncf %220 : vector<4x8xf32> to vector<4x8xbf16>
    %cst_95 = arith.constant dense<0.000000e+00> : vector<4x4xf32>
    %222 = tpu.matmul %217, %219, %cst_95 {dimension_numbers = #tpu.dot_dimension_numbers<[1], [1], [0], [0], [0, 0, 1, 0], [], []>} : vector<4x8xbf16>, vector<4x8xbf16>, vector<4x4xf32> -> vector<4x4xf32>
    %cst_96 = arith.constant dense<0xFF800000> : vector<4xf32>
    %223 = vector.multi_reduction <maximumf>, %222, %cst_96 [1] : vector<4x4xf32> to vector<4xf32>
    %224 = vector.shape_cast %223 : vector<4xf32> to vector<4x1xf32>
    %225 = vector.broadcast %224 : vector<4x1xf32> to vector<4x4xf32>
    %226 = arith.subf %222, %225 : vector<4x4xf32>
    %227 = math.exp %226 : vector<4x4xf32>
    %cst_97 = arith.constant dense<0.000000e+00> : vector<4xf32>
    %228 = vector.multi_reduction <add>, %227, %cst_97 [1] : vector<4x4xf32> to vector<4xf32>
    %229 = vector.shape_cast %228 : vector<4xf32> to vector<4x1xf32>
    %230 = vector.broadcast %229 : vector<4x1xf32> to vector<4x4xf32>
    %231 = arith.divf %227, %230 : vector<4x4xf32>
    %232 = arith.truncf %231 : vector<4x4xf32> to vector<4x4xbf16>
    %cst_98 = arith.constant dense<0.000000e+00> : vector<4x8xf32>
    %233 = tpu.matmul %232, %221, %cst_98 {dimension_numbers = #tpu.dot_dimension_numbers<[1], [0], [0], [1], [0, 0, 1, 1], [], []>} : vector<4x4xbf16>, vector<4x8xbf16>, vector<4x8xf32> -> vector<4x8xf32>
    %234 = vector.extract_strided_slice %215 {offsets = [0, 8], sizes = [4, 8], strides = [1, 1]} : vector<4x96xf32> to vector<4x8xf32>
    %235 = arith.truncf %234 : vector<4x8xf32> to vector<4x8xbf16>
    %236 = vector.extract_strided_slice %215 {offsets = [0, 40], sizes = [4, 8], strides = [1, 1]} : vector<4x96xf32> to vector<4x8xf32>
    %237 = arith.truncf %236 : vector<4x8xf32> to vector<4x8xbf16>
    %238 = vector.extract_strided_slice %215 {offsets = [0, 72], sizes = [4, 8], strides = [1, 1]} : vector<4x96xf32> to vector<4x8xf32>
    %239 = arith.truncf %238 : vector<4x8xf32> to vector<4x8xbf16>
    %cst_99 = arith.constant dense<0.000000e+00> : vector<4x4xf32>
    %240 = tpu.matmul %235, %237, %cst_99 {dimension_numbers = #tpu.dot_dimension_numbers<[1], [1], [0], [0], [0, 0, 1, 0], [], []>} : vector<4x8xbf16>, vector<4x8xbf16>, vector<4x4xf32> -> vector<4x4xf32>
    %cst_100 = arith.constant dense<0xFF800000> : vector<4xf32>
    %241 = vector.multi_reduction <maximumf>, %240, %cst_100 [1] : vector<4x4xf32> to vector<4xf32>
    %242 = vector.shape_cast %241 : vector<4xf32> to vector<4x1xf32>
    %243 = vector.broadcast %242 : vector<4x1xf32> to vector<4x4xf32>
    %244 = arith.subf %240, %243 : vector<4x4xf32>
    %245 = math.exp %244 : vector<4x4xf32>
    %cst_101 = arith.constant dense<0.000000e+00> : vector<4xf32>
    %246 = vector.multi_reduction <add>, %245, %cst_101 [1] : vector<4x4xf32> to vector<4xf32>
    %247 = vector.shape_cast %246 : vector<4xf32> to vector<4x1xf32>
    %248 = vector.broadcast %247 : vector<4x1xf32> to vector<4x4xf32>
    %249 = arith.divf %245, %248 : vector<4x4xf32>
    %250 = arith.truncf %249 : vector<4x4xf32> to vector<4x4xbf16>
    %cst_102 = arith.constant dense<0.000000e+00> : vector<4x8xf32>
    %251 = tpu.matmul %250, %239, %cst_102 {dimension_numbers = #tpu.dot_dimension_numbers<[1], [0], [0], [1], [0, 0, 1, 1], [], []>} : vector<4x4xbf16>, vector<4x8xbf16>, vector<4x8xf32> -> vector<4x8xf32>
    %252 = vector.extract_strided_slice %215 {offsets = [0, 16], sizes = [4, 8], strides = [1, 1]} : vector<4x96xf32> to vector<4x8xf32>
    %253 = arith.truncf %252 : vector<4x8xf32> to vector<4x8xbf16>
    %254 = vector.extract_strided_slice %215 {offsets = [0, 48], sizes = [4, 8], strides = [1, 1]} : vector<4x96xf32> to vector<4x8xf32>
    %255 = arith.truncf %254 : vector<4x8xf32> to vector<4x8xbf16>
    %256 = vector.extract_strided_slice %215 {offsets = [0, 80], sizes = [4, 8], strides = [1, 1]} : vector<4x96xf32> to vector<4x8xf32>
    %257 = arith.truncf %256 : vector<4x8xf32> to vector<4x8xbf16>
    %cst_103 = arith.constant dense<0.000000e+00> : vector<4x4xf32>
    %258 = tpu.matmul %253, %255, %cst_103 {dimension_numbers = #tpu.dot_dimension_numbers<[1], [1], [0], [0], [0, 0, 1, 0], [], []>} : vector<4x8xbf16>, vector<4x8xbf16>, vector<4x4xf32> -> vector<4x4xf32>
    %cst_104 = arith.constant dense<0xFF800000> : vector<4xf32>
    %259 = vector.multi_reduction <maximumf>, %258, %cst_104 [1] : vector<4x4xf32> to vector<4xf32>
    %260 = vector.shape_cast %259 : vector<4xf32> to vector<4x1xf32>
    %261 = vector.broadcast %260 : vector<4x1xf32> to vector<4x4xf32>
    %262 = arith.subf %258, %261 : vector<4x4xf32>
    %263 = math.exp %262 : vector<4x4xf32>
    %cst_105 = arith.constant dense<0.000000e+00> : vector<4xf32>
    %264 = vector.multi_reduction <add>, %263, %cst_105 [1] : vector<4x4xf32> to vector<4xf32>
    %265 = vector.shape_cast %264 : vector<4xf32> to vector<4x1xf32>
    %266 = vector.broadcast %265 : vector<4x1xf32> to vector<4x4xf32>
    %267 = arith.divf %263, %266 : vector<4x4xf32>
    %268 = arith.truncf %267 : vector<4x4xf32> to vector<4x4xbf16>
    %cst_106 = arith.constant dense<0.000000e+00> : vector<4x8xf32>
    %269 = tpu.matmul %268, %257, %cst_106 {dimension_numbers = #tpu.dot_dimension_numbers<[1], [0], [0], [1], [0, 0, 1, 1], [], []>} : vector<4x4xbf16>, vector<4x8xbf16>, vector<4x8xf32> -> vector<4x8xf32>
    %270 = vector.extract_strided_slice %215 {offsets = [0, 24], sizes = [4, 8], strides = [1, 1]} : vector<4x96xf32> to vector<4x8xf32>
    %271 = arith.truncf %270 : vector<4x8xf32> to vector<4x8xbf16>
    %272 = vector.extract_strided_slice %215 {offsets = [0, 56], sizes = [4, 8], strides = [1, 1]} : vector<4x96xf32> to vector<4x8xf32>
    %273 = arith.truncf %272 : vector<4x8xf32> to vector<4x8xbf16>
    %274 = vector.extract_strided_slice %215 {offsets = [0, 88], sizes = [4, 8], strides = [1, 1]} : vector<4x96xf32> to vector<4x8xf32>
    %275 = arith.truncf %274 : vector<4x8xf32> to vector<4x8xbf16>
    %cst_107 = arith.constant dense<0.000000e+00> : vector<4x4xf32>
    %276 = tpu.matmul %271, %273, %cst_107 {dimension_numbers = #tpu.dot_dimension_numbers<[1], [1], [0], [0], [0, 0, 1, 0], [], []>} : vector<4x8xbf16>, vector<4x8xbf16>, vector<4x4xf32> -> vector<4x4xf32>
    %cst_108 = arith.constant dense<0xFF800000> : vector<4xf32>
    %277 = vector.multi_reduction <maximumf>, %276, %cst_108 [1] : vector<4x4xf32> to vector<4xf32>
    %278 = vector.shape_cast %277 : vector<4xf32> to vector<4x1xf32>
    %279 = vector.broadcast %278 : vector<4x1xf32> to vector<4x4xf32>
    %280 = arith.subf %276, %279 : vector<4x4xf32>
    %281 = math.exp %280 : vector<4x4xf32>
    %cst_109 = arith.constant dense<0.000000e+00> : vector<4xf32>
    %282 = vector.multi_reduction <add>, %281, %cst_109 [1] : vector<4x4xf32> to vector<4xf32>
    %283 = vector.shape_cast %282 : vector<4xf32> to vector<4x1xf32>
    %284 = vector.broadcast %283 : vector<4x1xf32> to vector<4x4xf32>
    %285 = arith.divf %281, %284 : vector<4x4xf32>
    %286 = arith.truncf %285 : vector<4x4xf32> to vector<4x4xbf16>
    %cst_110 = arith.constant dense<0.000000e+00> : vector<4x8xf32>
    %287 = tpu.matmul %286, %275, %cst_110 {dimension_numbers = #tpu.dot_dimension_numbers<[1], [0], [0], [1], [0, 0, 1, 1], [], []>} : vector<4x4xbf16>, vector<4x8xbf16>, vector<4x8xf32> -> vector<4x8xf32>
    %288 = tpu.concatenate %233, %251, %269, %287 in 1 : vector<4x8xf32>, vector<4x8xf32>, vector<4x8xf32>, vector<4x8xf32> -> vector<4x32xf32>
    %289 = arith.truncf %288 : vector<4x32xf32> to vector<4x32xbf16>
    %c1_111 = arith.constant 1 : index
    %c0_112 = arith.constant 0 : index
    %c0_113 = arith.constant 0 : index
    %290 = vector.load %arg9[%c1_111, %c0_112, %c0_113] : memref<2x32x32xbf16, #tpu.memory_space<vmem>>, vector<1x32x32xbf16>
    %291 = vector.shape_cast %290 : vector<1x32x32xbf16> to vector<32x32xbf16>
    %cst_114 = arith.constant dense<0.000000e+00> : vector<4x32xf32>
    %292 = tpu.matmul %289, %291, %cst_114 {dimension_numbers = #tpu.dot_dimension_numbers<[1], [0], [0], [1], [0, 0, 1, 1], [], []>} : vector<4x32xbf16>, vector<32x32xbf16>, vector<4x32xf32> -> vector<4x32xf32>
    %c1_115 = arith.constant 1 : index
    %c0_116 = arith.constant 0 : index
    %c0_117 = arith.constant 0 : index
    %293 = vector.load %arg10[%c1_115, %c0_116, %c0_117] : memref<2x1x32xf32, #tpu.memory_space<vmem>>, vector<1x1x32xf32>
    %294 = vector.shape_cast %293 : vector<1x1x32xf32> to vector<1x32xf32>
    %295 = vector.broadcast %294 : vector<1x32xf32> to vector<4x32xf32>
    %296 = arith.addf %292, %295 : vector<4x32xf32>
    %297 = arith.addf %181, %296 : vector<4x32xf32>
    %c1_118 = arith.constant 1 : index
    %c0_119 = arith.constant 0 : index
    %c0_120 = arith.constant 0 : index
    %298 = vector.load %arg11[%c1_118, %c0_119, %c0_120] : memref<2x1x32xf32, #tpu.memory_space<vmem>>, vector<1x1x32xf32>
    %299 = vector.shape_cast %298 : vector<1x1x32xf32> to vector<1x32xf32>
    %c1_121 = arith.constant 1 : index
    %c0_122 = arith.constant 0 : index
    %c0_123 = arith.constant 0 : index
    %300 = vector.load %arg12[%c1_121, %c0_122, %c0_123] : memref<2x1x32xf32, #tpu.memory_space<vmem>>, vector<1x1x32xf32>
    %301 = vector.shape_cast %300 : vector<1x1x32xf32> to vector<1x32xf32>
    %cst_124 = arith.constant dense<0.000000e+00> : vector<4xf32>
    %302 = vector.multi_reduction <add>, %297, %cst_124 [1] : vector<4x32xf32> to vector<4xf32>
    %303 = vector.shape_cast %302 : vector<4xf32> to vector<4x1xf32>
    %cst_125 = arith.constant 3.200000e+01 : f32
    %304 = vector.broadcast %cst_125 : f32 to vector<4x1xf32>
    %305 = arith.divf %303, %304 : vector<4x1xf32>
    %306 = vector.broadcast %305 : vector<4x1xf32> to vector<4x32xf32>
    %307 = arith.subf %297, %306 : vector<4x32xf32>
    %308 = arith.mulf %307, %307 : vector<4x32xf32>
    %cst_126 = arith.constant dense<0.000000e+00> : vector<4xf32>
    %309 = vector.multi_reduction <add>, %308, %cst_126 [1] : vector<4x32xf32> to vector<4xf32>
    %310 = vector.shape_cast %309 : vector<4xf32> to vector<4x1xf32>
    %cst_127 = arith.constant 3.200000e+01 : f32
    %311 = vector.broadcast %cst_127 : f32 to vector<4x1xf32>
    %312 = arith.divf %310, %311 : vector<4x1xf32>
    %313 = vector.broadcast %305 : vector<4x1xf32> to vector<4x32xf32>
    %314 = arith.subf %297, %313 : vector<4x32xf32>
    %cst_128 = arith.constant 9.99999997E-7 : f32
    %315 = vector.broadcast %cst_128 : f32 to vector<4x1xf32>
    %316 = arith.addf %312, %315 : vector<4x1xf32>
    %317 = math.rsqrt %316 : vector<4x1xf32>
    %318 = vector.broadcast %317 : vector<4x1xf32> to vector<4x32xf32>
    %319 = arith.mulf %314, %318 : vector<4x32xf32>
    %320 = vector.broadcast %299 : vector<1x32xf32> to vector<4x32xf32>
    %321 = arith.mulf %319, %320 : vector<4x32xf32>
    %322 = vector.broadcast %301 : vector<1x32xf32> to vector<4x32xf32>
    %323 = arith.addf %321, %322 : vector<4x32xf32>
    %324 = arith.truncf %323 : vector<4x32xf32> to vector<4x32xbf16>
    %c1_129 = arith.constant 1 : index
    %c0_130 = arith.constant 0 : index
    %c0_131 = arith.constant 0 : index
    %325 = vector.load %arg13[%c1_129, %c0_130, %c0_131] : memref<2x32x64xbf16, #tpu.memory_space<vmem>>, vector<1x32x64xbf16>
    %326 = vector.shape_cast %325 : vector<1x32x64xbf16> to vector<32x64xbf16>
    %cst_132 = arith.constant dense<0.000000e+00> : vector<4x64xf32>
    %327 = tpu.matmul %324, %326, %cst_132 {dimension_numbers = #tpu.dot_dimension_numbers<[1], [0], [0], [1], [0, 0, 1, 1], [], []>} : vector<4x32xbf16>, vector<32x64xbf16>, vector<4x64xf32> -> vector<4x64xf32>
    %c1_133 = arith.constant 1 : index
    %c0_134 = arith.constant 0 : index
    %c0_135 = arith.constant 0 : index
    %328 = vector.load %arg14[%c1_133, %c0_134, %c0_135] : memref<2x1x64xf32, #tpu.memory_space<vmem>>, vector<1x1x64xf32>
    %329 = vector.shape_cast %328 : vector<1x1x64xf32> to vector<1x64xf32>
    %330 = vector.broadcast %329 : vector<1x64xf32> to vector<4x64xf32>
    %331 = arith.addf %327, %330 : vector<4x64xf32>
    %cst_136 = arith.constant 5.000000e-01 : f32
    %332 = vector.broadcast %cst_136 : f32 to vector<4x64xf32>
    %333 = arith.mulf %332, %331 : vector<4x64xf32>
    %cst_137 = arith.constant 4.471500e-02 : f32
    %334 = vector.broadcast %cst_137 : f32 to vector<4x64xf32>
    %335 = arith.mulf %334, %331 : vector<4x64xf32>
    %336 = arith.mulf %335, %331 : vector<4x64xf32>
    %337 = arith.mulf %336, %331 : vector<4x64xf32>
    %338 = arith.addf %331, %337 : vector<4x64xf32>
    %cst_138 = arith.constant 0.797884583 : f32
    %339 = vector.broadcast %cst_138 : f32 to vector<4x64xf32>
    %340 = arith.mulf %339, %338 : vector<4x64xf32>
    %341 = math.tanh %340 : vector<4x64xf32>
    %cst_139 = arith.constant 1.000000e+00 : f32
    %342 = vector.broadcast %cst_139 : f32 to vector<4x64xf32>
    %343 = arith.addf %342, %341 : vector<4x64xf32>
    %344 = arith.mulf %333, %343 : vector<4x64xf32>
    %345 = arith.truncf %344 : vector<4x64xf32> to vector<4x64xbf16>
    %c1_140 = arith.constant 1 : index
    %c0_141 = arith.constant 0 : index
    %c0_142 = arith.constant 0 : index
    %346 = vector.load %arg15[%c1_140, %c0_141, %c0_142] : memref<2x64x32xbf16, #tpu.memory_space<vmem>>, vector<1x64x32xbf16>
    %347 = vector.shape_cast %346 : vector<1x64x32xbf16> to vector<64x32xbf16>
    %cst_143 = arith.constant dense<0.000000e+00> : vector<4x32xf32>
    %348 = tpu.matmul %345, %347, %cst_143 {dimension_numbers = #tpu.dot_dimension_numbers<[1], [0], [0], [1], [0, 0, 1, 1], [], []>} : vector<4x64xbf16>, vector<64x32xbf16>, vector<4x32xf32> -> vector<4x32xf32>
    %c1_144 = arith.constant 1 : index
    %c0_145 = arith.constant 0 : index
    %c0_146 = arith.constant 0 : index
    %349 = vector.load %arg16[%c1_144, %c0_145, %c0_146] : memref<2x1x32xf32, #tpu.memory_space<vmem>>, vector<1x1x32xf32>
    %350 = vector.shape_cast %349 : vector<1x1x32xf32> to vector<1x32xf32>
    %351 = vector.broadcast %350 : vector<1x32xf32> to vector<4x32xf32>
    %352 = arith.addf %348, %351 : vector<4x32xf32>
    %353 = arith.addf %297, %352 : vector<4x32xf32>
    %c0_147 = arith.constant 0 : index
    %c0_148 = arith.constant 0 : index
    %354 = vector.load %arg17[%c0_147, %c0_148] : memref<1x32xf32, #tpu.memory_space<vmem>>, vector<1x32xf32>
    %c0_149 = arith.constant 0 : index
    %c0_150 = arith.constant 0 : index
    %355 = vector.load %arg18[%c0_149, %c0_150] : memref<1x32xf32, #tpu.memory_space<vmem>>, vector<1x32xf32>
    %cst_151 = arith.constant dense<0.000000e+00> : vector<4xf32>
    %356 = vector.multi_reduction <add>, %353, %cst_151 [1] : vector<4x32xf32> to vector<4xf32>
    %357 = vector.shape_cast %356 : vector<4xf32> to vector<4x1xf32>
    %cst_152 = arith.constant 3.200000e+01 : f32
    %358 = vector.broadcast %cst_152 : f32 to vector<4x1xf32>
    %359 = arith.divf %357, %358 : vector<4x1xf32>
    %360 = vector.broadcast %359 : vector<4x1xf32> to vector<4x32xf32>
    %361 = arith.subf %353, %360 : vector<4x32xf32>
    %362 = arith.mulf %361, %361 : vector<4x32xf32>
    %cst_153 = arith.constant dense<0.000000e+00> : vector<4xf32>
    %363 = vector.multi_reduction <add>, %362, %cst_153 [1] : vector<4x32xf32> to vector<4xf32>
    %364 = vector.shape_cast %363 : vector<4xf32> to vector<4x1xf32>
    %cst_154 = arith.constant 3.200000e+01 : f32
    %365 = vector.broadcast %cst_154 : f32 to vector<4x1xf32>
    %366 = arith.divf %364, %365 : vector<4x1xf32>
    %367 = vector.broadcast %359 : vector<4x1xf32> to vector<4x32xf32>
    %368 = arith.subf %353, %367 : vector<4x32xf32>
    %cst_155 = arith.constant 9.99999997E-7 : f32
    %369 = vector.broadcast %cst_155 : f32 to vector<4x1xf32>
    %370 = arith.addf %366, %369 : vector<4x1xf32>
    %371 = math.rsqrt %370 : vector<4x1xf32>
    %372 = vector.broadcast %371 : vector<4x1xf32> to vector<4x32xf32>
    %373 = arith.mulf %368, %372 : vector<4x32xf32>
    %374 = vector.broadcast %354 : vector<1x32xf32> to vector<4x32xf32>
    %375 = arith.mulf %373, %374 : vector<4x32xf32>
    %376 = vector.broadcast %355 : vector<1x32xf32> to vector<4x32xf32>
    %377 = arith.addf %375, %376 : vector<4x32xf32>
    %c0_156 = arith.constant 0 : index
    %c0_157 = arith.constant 0 : index
    %c0_158 = arith.constant 0 : index
    %378 = vector.load %arg19[%c0_156, %c0_157, %c0_158] : memref<1x4x32xf32, #tpu.memory_space<vmem>>, vector<1x4x32xf32>
    %379 = vector.shape_cast %378 : vector<1x4x32xf32> to vector<4x32xf32>
    %380 = vector.shape_cast %377 : vector<4x32xf32> to vector<1x4x32xf32>
    tpu.vector_store %arg19[%c0_156, %c0_157, %c0_158], %380 {strides = array<i32>} : memref<1x4x32xf32, #tpu.memory_space<vmem>>, vector<1x4x32xf32>,
    return
  }
  func.func @transform_0(%arg0: i32) -> (i32, i32, i32) {
    %c0_i32 = arith.constant 0 : i32
    %c0_i32_0 = arith.constant 0 : i32
    %c0_i32_1 = arith.constant 0 : i32
    return %arg0, %c0_i32, %c0_i32_0 : i32, i32, i32
  }
  func.func @transform_1(%arg0: i32) -> (i32, i32) {
    %c0_i32 = arith.constant 0 : i32
    %c0_i32_0 = arith.constant 0 : i32
    %c0_i32_1 = arith.constant 0 : i32
    return %c0_i32, %c0_i32_0 : i32, i32
  }
  func.func @transform_2(%arg0: i32) -> (i32, i32) {
    %c0_i32 = arith.constant 0 : i32
    %c0_i32_0 = arith.constant 0 : i32
    %c0_i32_1 = arith.constant 0 : i32
    return %c0_i32, %c0_i32_0 : i32, i32
  }
  func.func @transform_3(%arg0: i32) -> (i32, i32) {
    %c0_i32 = arith.constant 0 : i32
    %c0_i32_0 = arith.constant 0 : i32
    %c0_i32_1 = arith.constant 0 : i32
    return %c0_i32, %c0_i32_0 : i32, i32
  }
  func.func @transform_4(%arg0: i32) -> (i32, i32, i32) {
    %c0_i32 = arith.constant 0 : i32
    %c0_i32_0 = arith.constant 0 : i32
    %c0_i32_1 = arith.constant 0 : i32
    %c0_i32_2 = arith.constant 0 : i32
    return %c0_i32, %c0_i32_0, %c0_i32_1 : i32, i32, i32
  }
  func.func @transform_5(%arg0: i32) -> (i32, i32, i32) {
    %c0_i32 = arith.constant 0 : i32
    %c0_i32_0 = arith.constant 0 : i32
    %c0_i32_1 = arith.constant 0 : i32
    %c0_i32_2 = arith.constant 0 : i32
    return %c0_i32, %c0_i32_0, %c0_i32_1 : i32, i32, i32
  }
  func.func @transform_6(%arg0: i32) -> (i32, i32, i32) {
    %c0_i32 = arith.constant 0 : i32
    %c0_i32_0 = arith.constant 0 : i32
    %c0_i32_1 = arith.constant 0 : i32
    %c0_i32_2 = arith.constant 0 : i32
    return %c0_i32, %c0_i32_0, %c0_i32_1 : i32, i32, i32
  }
  func.func @transform_7(%arg0: i32) -> (i32, i32, i32) {
    %c0_i32 = arith.constant 0 : i32
    %c0_i32_0 = arith.constant 0 : i32
    %c0_i32_1 = arith.constant 0 : i32
    %c0_i32_2 = arith.constant 0 : i32
    return %c0_i32, %c0_i32_0, %c0_i32_1 : i32, i32, i32
  }
  func.func @transform_8(%arg0: i32) -> (i32, i32, i32) {
    %c0_i32 = arith.constant 0 : i32
    %c0_i32_0 = arith.constant 0 : i32
    %c0_i32_1 = arith.constant 0 : i32
    %c0_i32_2 = arith.constant 0 : i32
    return %c0_i32, %c0_i32_0, %c0_i32_1 : i32, i32, i32
  }
  func.func @transform_9(%arg0: i32) -> (i32, i32, i32) {
    %c0_i32 = arith.constant 0 : i32
    %c0_i32_0 = arith.constant 0 : i32
    %c0_i32_1 = arith.constant 0 : i32
    %c0_i32_2 = arith.constant 0 : i32
    return %c0_i32, %c0_i32_0, %c0_i32_1 : i32, i32, i32
  }
  func.func @transform_10(%arg0: i32) -> (i32, i32, i32) {
    %c0_i32 = arith.constant 0 : i32
    %c0_i32_0 = arith.constant 0 : i32
    %c0_i32_1 = arith.constant 0 : i32
    %c0_i32_2 = arith.constant 0 : i32
    return %c0_i32, %c0_i32_0, %c0_i32_1 : i32, i32, i32
  }
  func.func @transform_11(%arg0: i32) -> (i32, i32, i32) {
    %c0_i32 = arith.constant 0 : i32
    %c0_i32_0 = arith.constant 0 : i32
    %c0_i32_1 = arith.constant 0 : i32
    %c0_i32_2 = arith.constant 0 : i32
    return %c0_i32, %c0_i32_0, %c0_i32_1 : i32, i32, i32
  }
  func.func @transform_12(%arg0: i32) -> (i32, i32, i32) {
    %c0_i32 = arith.constant 0 : i32
    %c0_i32_0 = arith.constant 0 : i32
    %c0_i32_1 = arith.constant 0 : i32
    %c0_i32_2 = arith.constant 0 : i32
    return %c0_i32, %c0_i32_0, %c0_i32_1 : i32, i32, i32
  }
  func.func @transform_13(%arg0: i32) -> (i32, i32, i32) {
    %c0_i32 = arith.constant 0 : i32
    %c0_i32_0 = arith.constant 0 : i32
    %c0_i32_1 = arith.constant 0 : i32
    %c0_i32_2 = arith.constant 0 : i32
    return %c0_i32, %c0_i32_0, %c0_i32_1 : i32, i32, i32
  }
  func.func @transform_14(%arg0: i32) -> (i32, i32, i32) {
    %c0_i32 = arith.constant 0 : i32
    %c0_i32_0 = arith.constant 0 : i32
    %c0_i32_1 = arith.constant 0 : i32
    %c0_i32_2 = arith.constant 0 : i32
    return %c0_i32, %c0_i32_0, %c0_i32_1 : i32, i32, i32
  }
  func.func @transform_15(%arg0: i32) -> (i32, i32, i32) {
    %c0_i32 = arith.constant 0 : i32
    %c0_i32_0 = arith.constant 0 : i32
    %c0_i32_1 = arith.constant 0 : i32
    %c0_i32_2 = arith.constant 0 : i32
    return %c0_i32, %c0_i32_0, %c0_i32_1 : i32, i32, i32
  }
  func.func @transform_16(%arg0: i32) -> (i32, i32) {
    %c0_i32 = arith.constant 0 : i32
    %c0_i32_0 = arith.constant 0 : i32
    %c0_i32_1 = arith.constant 0 : i32
    return %c0_i32, %c0_i32_0 : i32, i32
  }
  func.func @transform_17(%arg0: i32) -> (i32, i32) {
    %c0_i32 = arith.constant 0 : i32
    %c0_i32_0 = arith.constant 0 : i32
    %c0_i32_1 = arith.constant 0 : i32
    return %c0_i32, %c0_i32_0 : i32, i32
  }
  func.func @transform_18(%arg0: i32) -> (i32, i32, i32) {
    %c0_i32 = arith.constant 0 : i32
    %c0_i32_0 = arith.constant 0 : i32
    %c0_i32_1 = arith.constant 0 : i32
    return %arg0, %c0_i32, %c0_i32_0 : i32, i32, i32
  }
}

</mosaic_0001>

<bundles_post_ra>
// kernel: siglip_vision_model.1
= control target key start
LH: loop header
LB: loop body
LE: loop exit
PB: predicated region body
PF: predicated region fallthrough
CT: control target
= control target key end

     0   :  { %s3614_s0 = inlined_call_operand.vmem [shape: f32[2,4,192], index: 0, kind: input, shape index: {}]   ;;  %s3615_s1 = inlined_call_operand.vmem [shape: bf16[192,32], index: 1, kind: input, shape index: {}]   ;;  %s3616_s2 = inlined_call_operand.vmem [shape: f32[1,32], index: 2, kind: input, shape index: {}]   ;;  %s3617_s3 = inlined_call_operand.vmem [shape: f32[4,32], index: 3, kind: input, shape index: {}]   ;;  %s3618_s4 = inlined_call_operand.vmem [shape: f32[2,1,32], index: 4, kind: input, shape index: {}]   ;;  %s3619_s5 = inlined_call_operand.vmem [shape: f32[2,1,32], index: 5, kind: input, shape index: {}]   ;;  %s3620_s6 = inlined_call_operand.vmem [shape: bf16[2,32,96], index: 6, kind: input, shape index: {}]   ;;  %s3621_s7 = inlined_call_operand.vmem [shape: f32[2,1,96], index: 7, kind: input, shape index: {}]   ;;  %s3622_s8 = inlined_call_operand.vmem [shape: bf16[2,32,32], index: 8, kind: input, shape index: {}]   ;;  %s3623_s9 = inlined_call_operand.vmem [shape: f32[2,1,32], index: 9, kind: input, shape index: {}]   ;;  %s3624_s10 = inlined_call_operand.vmem [shape: f32[2,1,32], index: 10, kind: input, shape index: {}]   ;;  %s3625_s11 = inlined_call_operand.vmem [shape: f32[2,1,32], index: 11, kind: input, shape index: {}]   ;;  %s3626_s12 = inlined_call_operand.vmem [shape: bf16[2,32,64], index: 12, kind: input, shape index: {}]   ;;  %s3627_s13 = inlined_call_operand.vmem [shape: f32[2,1,64], index: 13, kind: input, shape index: {}]   ;;  %s3628_s14 = inlined_call_operand.vmem [shape: bf16[2,64,32], index: 14, kind: input, shape index: {}]   ;;  %s3629_s15 = inlined_call_operand.vmem [shape: f32[2,1,32], index: 15, kind: input, shape index: {}]   ;;  %s3630_s16 = inlined_call_operand.vmem [shape: f32[1,32], index: 16, kind: input, shape index: {}]   ;;  %s3631_s17 = inlined_call_operand.vmem [shape: f32[1,32], index: 17, kind: input, shape index: {}]   ;;  %s3632_s18 = inlined_call_operand.hbm [shape: f32[2,4,32], index: 18, kind: output, shape index: {}]  }
   0x1   :  { %3651 = sst [smem:[#allocation11_spill]] %s3614_s0 }
   0x2   :  { %3652 = sst [smem:[#allocation12_spill]] %s3615_s1 }
   0x3   :  { %3653 = sst [smem:[#allocation13_spill]] %s3616_s2 }
   0x4   :  { %3654 = sst [smem:[#allocation14_spill]] %s3617_s3 }
   0x5   :  { %3655 = sst [smem:[#allocation15_spill]] %s3632_s18 }
   0x6   :  { %23 = vsyncpa [#allocation3], 0 }
   0x7   :  { %25 = vsyncpa [#allocation3 + $0x1], 0  ;;  %s3126_s27 = smov 0   ;;  %s3128_s28 = smov 0  }
   0x8   :  { %s3130_s29 = smov 0   ;;  %s3132_s30 = smov 0  }
   0x9 LB: > { %3656 = sst [smem:[#allocation5_spill]] %s2999_s27  ;;  %s3147_s0 = sadd.s32 4294967295, %s3011_s30   ;;  %s3011_s30 = sphi %s3132_s30, %s3682_s30   ;;  %s3007_s29 = sphi %s3130_s29, %s3684_s29   ;;  %s3003_s28 = sphi %s3128_s28, %s3686_s28   ;;  %s2999_s27 = sphi %s3126_s27, %s3685_s27  }
   0xa   : > { %3657 = sst [smem:[#allocation6_spill]] %s3007_s29  ;;  %s2470_s19 = sadd.s32 4294967294, %s3011_s30  }
   0xb   : > { %3658 = sst [smem:[#allocation7_spill]] %s3011_s30  ;;  %s3151_s1 = sadd.s32 1, %s3011_s30  }
   0xc   : > { %3659 = sst [smem:[#allocation8_spill]] %s3151_s1  ;;  %s421_s20 = sadd.s32 1, %s3007_s29 }
   0xd   : > { %s418_s21 = ssub.s32 %s3011_s30, %s3151_s1  ;;  %p431_p0 = scmp.ne.s32.totalorder %s3007_s29, %s3003_s28 }
   0xe   : > { %p419_p1 = scmp.eq.s32.totalorder %s418_s21, 0  ;;  %p432_p2 = scmp.eq.s32.totalorder %s3147_s0, 1 }
   0xf   : > { %p437_p3 = scmp.ne.s32.totalorder %s3003_s28, %s2999_s27  ;;  %p438_p4 = scmp.eq.s32.totalorder %s2470_s19, 1 }
  0x10   : > { %s3162_s22 = scalar_select %p419_p1, %s3007_s29, %s421_s20  }
  0x11   : > { %p3164_p5 = por %p432_p2, %p431_p0  ;;  %p3168_p6 = por %p438_p4, %p437_p3 }
  0x12   : > { %3660 = sst [smem:[#allocation9_spill]] %s3162_s22  ;;  %p2473_p7 = scmp.ge.s32.totalorder %s3011_s30, 1 }
  0x13   : > { %s3662_s23 = scalar_select %p3168_p6, 1, 0 }
  0x14   : > { %p515_p8 = scmp.lt.s32.totalorder %s3011_s30, 3 }
  0x15   : > { %3663 = sst [smem:[#allocation10_spill]] %s3662_s23 }
  0x16   : > { %p516_p9 = pnand %p2473_p7, %p515_p8 }
  0x17   : > { %s3664_s26 = sld [smem:[#allocation12_spill]] (!%p516_p9)  ;;  %v3013_v1 = vmov (!%p516_p9), 0   ;;  %p569_p10 = scmp.lt.s32.totalorder (!%p516_p9), %s3147_s0, 1  ;;  %vm684_vm0 = vcmask (!%p516_p9), 523264   ;;  %vm732_vm1 = vcmask (!%p516_p9), 257024   ;;  %v2883_v31 = vld [vmem:[%s3620_s6] sm:$0xff] (!%p516_p9)  }
  0x18   : > { %519 = sbr.rel (%p516_p9) target bundleno = 7289 (0x1c79), region = 92  ;;  %688 = vmatprep.subr.bf16.mxu0 (!%p516_p9), %v3013_v1  ;;  %s3665_s23 = sld [smem:[#allocation11_spill]] (!%p516_p9)  ;;  %v3014_v32 = vmov (!%p516_p9), 0.0   ;;  %vm3015_vm2 = vmmov (!%p516_p9), 0   ;;  %v2884_v33 = vld [vmem:[%s3620_s6 + $0x8] sm:$0xff] (!%p516_p9)   ;;  %vm785_vm3 = vcmask (!%p516_p9), 261120  }
  0x19   : > { %s3667_s3 = sld [smem:[#allocation14_spill]] (!%p516_p9)  ;;  %2646 = vmatprep.subr.bf16.mxu1 (!%p516_p9), %v3014_v32  ;;  %2650 = vmatprep.mubr.msk.bf16.mxu1 (!%p516_p9), %vm3015_vm2, %v3014_v32  ;;  %v2491_v38 = vld [vmem:[%s3618_s4] ss:$0 sm:$0xff] (!%p516_p9)  ;;  %vm833_vm4 = vcmask (!%p516_p9), 64512   ;;  %vm899_vm5 = vcmask (!%p516_p9), 1041408   ;;  %vm880_vm6 = vcmask (!%p516_p9), 27648  }
  0x1a   : > { %2647 = vmatpush3.bf16.msra.mxu1 (!%p516_p9), %v2883_v31  ;;  %v2492_v40 = vld [vmem:[%s3619_s5] ss:$0 sm:$0xff] (!%p516_p9)  ;;  %s3019_s24 = smov (!%p516_p9), 120   ;;  %vm895_vm7 = vcmask (!%p516_p9), 31744   ;;  %s3645_s25 = smov (!%p516_p9), 56   ;;  %vm1286_vm8 = vcmask (!%p516_p9), 130048  }
  0x1b   : > { %2648 = vmatprep.subr.bf16.mxu1 (!%p516_p9), %v3014_v32  ;;  %v2493_v44 = vld [vmem:[%s3621_s7] ss:$0 sm:$0xff] (!%p516_p9)  ;;  %s3021_s19 = smov (!%p516_p9), 80   ;;  %s3650_s20 = smov (!%p516_p9), 112   ;;  %vm1288_vm9 = vcmask (!%p516_p9), 195584  }
  0x1c   : > { %s3641_s29 = smov (!%p516_p9), 48   ;;  %s3649_s22 = smov (!%p516_p9), 72  }
  0x1d   : > { %v2870_v0 = vld [vmem:[%s3664_s26] sm:$0xff] (!%p516_p9)   ;;  %v2871_v2 = vld [vmem:[%s3664_s26 + $0x8] sm:$0xff] (!%p516_p9)   ;;  %v2872_v3 = vld [vmem:[%s3664_s26 + $0x10] sm:$0xff] (!%p516_p9)   ;;  %s3648_s18 = smov (!%p516_p9), 104   ;;  %s3644_s30 = smov (!%p516_p9), 40  }
  0x1e   : > { %689 = vmatpush1.bf16.msra.mxu0 (!%p516_p9), %v2870_v0  ;;  %v2873_v4 = vld [vmem:[%s3664_s26 + $0x18] sm:$0xff] (!%p516_p9)   ;;  %v2874_v5 = vld [vmem:[%s3664_s26 + $0x20] sm:$0xff] (!%p516_p9)   ;;  %v2875_v9 = vld [vmem:[%s3664_s26 + $0x28] sm:$0xff] (!%p516_p9)   ;;  %2649 = vmatpush3.bf16.msra.mxu1 (!%p516_p9), %v2884_v33 }
  0x1f   : > { %690 = vmatprep.subr.bf16.mxu0 %v3013_v1  ;;  %s570_s21 = scalar_select %p569_p10, %s3147_s0, 1  ;;  %v2876_v10 = vld [vmem:[%s3664_s26 + $0x30] sm:$0xff]   ;;  %v2877_v11 = vld [vmem:[%s3664_s26 + $0x38] sm:$0xff]   ;;  %v2878_v12 = vld [vmem:[%s3664_s26 + $0x40] sm:$0xff]   ;;  %2654 = vmatprep.subr.bf16.mxu1 %v3014_v32 }
  0x20   : > { %v2879_v13 = vld [vmem:[%s3664_s26 + $0x48] sm:$0xff]   ;;  %v2880_v14 = vld [vmem:[%s3664_s26 + $0x50] sm:$0xff]   ;;  %v2881_v15 = vld [vmem:[%s3664_s26 + $0x58] sm:$0xff]  }
  0x21   : > { %s2585_s1 = sshll.u32 %s570_s21, 3  ;;  %v728_v19 = vld [vmem:[%s3667_s3] sm:$0xf]  ;;  %s3018_s21 = smov 88  }
  0x22   : > { %691 = vmatpush1.bf16.msra.mxu0 %v2871_v2  ;;  %s573_s27 = scalar_lea.vmem %s3665_s23, %s2585_s1  ;;  %s3646_s1 = smov 64  }
  0x23   : > { %692 = vmatprep.subr.bf16.mxu0 %v3013_v1  ;;  %v575_v6 = vld [vmem:[%s573_s27] sm:$0xff]  ;;  %s3666_s27 = sld [smem:[#allocation13_spill]]  ;;  %s3017_s23 = smov 96  }
  0x24   : > { %v577_v7 = vcombine.high %v575_v6, %v575_v6  ;;  %v579_v16 = vpack.c.bf16 %v575_v6, %v575_v6 }
  0x26   : > { %693 = vmatpush1.bf16.msra.mxu0 %v2872_v3  ;;  %v580_v8 = vpack.c.bf16 %v577_v7, %v577_v7 }
  0x27   : > { %694 = vmatprep.subr.bf16.mxu0 %v3013_v1 }
  0x28   : > { %2490 = vmatprep.mubr.msk.bf16.mxu0 %vm684_vm0, %v580_v8 }
  0x29   : > { %v2477_v17 = vld [vmem:[%s3666_s27] ss:$0 sm:$0xff]  ;;  %s3643_s27 = smov 8  }
  0x2a   : > { %695 = vmatpush1.bf16.msra.mxu0 %v2873_v4 }
  0x2b   : > { %696 = vmatprep.subr.bf16.mxu0 %v3013_v1 }
  0x2e   : > { %697 = vmatpush1.bf16.msra.mxu0 %v2874_v5 }
  0x2f   : > { %698 = vmatprep.subr.bf16.mxu0 %v3013_v1 }
  0x32   : > { %699 = vmatpush1.bf16.msra.mxu0 %v2875_v9 }
  0x33   : > { %700 = vmatprep.subr.bf16.mxu0 %v3013_v1 }
  0x36   : > { %701 = vmatpush1.bf16.msra.mxu0 %v2876_v10 }
  0x37   : > { %702 = vmatprep.subr.bf16.mxu0 %v3013_v1 }
  0x3a   : > { %703 = vmatpush1.bf16.msra.mxu0 %v2877_v11 }
  0x3b   : > { %704 = vmatprep.subr.bf16.mxu0 %v3013_v1 }
  0x3e   : > { %705 = vmatpush1.bf16.msra.mxu0 %v2878_v12 }
  0x3f   : > { %706 = vmatprep.subr.bf16.mxu0 %v3013_v1 }
  0x42   : > { %707 = vmatpush1.bf16.msra.mxu0 %v2879_v13 }
  0x43   : > { %708 = vmatprep.subr.bf16.mxu0 %v3013_v1 }
  0x46   : > { %709 = vmatpush1.bf16.msra.mxu0 %v2880_v14 }
  0x47   : > { %710 = vmatprep.subr.bf16.mxu0 %v3013_v1 }
  0x4a   : > { %711 = vmatpush1.bf16.msra.mxu0 %v2881_v15 }
  0x4b   : > { %2696 = vmatprep.subr.bf16.mxu0 %v3014_v32 }
  0x4d   : > { %721 = vmatmul.mubr.bf16.vlgmr.msra.gmra.mrb[0].mxu0 %v579_v16 }
  0x4e   : > { %2698 = vmatprep.mubr.msk.bf16.mxu0 %vm3015_vm2, %v3014_v32 }
 0x120   : > { %v722_v18 = vpop.f32.mrb[0].mxu0 }
 0x121   : > { %v723_v20 = vadd.f32 %v2477_v17, %v722_v18  ;;  %v724_v21 = vpop.f32.mrb[1].mxu0 }
 0x122   : > { %v725_v22 = vpop.f32.mrb[2].mxu0 }
 0x123   : > { %v3222_v23 = vadd.f32 %v728_v19, %v723_v20  ;;  %v726_v24 = vpop.f32.mrb[3].mxu0 }
 0x125   : > { %v733_v25 = vsel %vm732_vm1, %v3222_v23, 0.0 }
 0x126   : > { %734 = vadd.xlane.f32.xlu0 %v733_v25 }
 0x1b3   : > { %v735_v26 = vpop.xlane.xlu0 %734 }
 0x1b4   : > { %v737_v27 = vmul.f32 0.03125, %v735_v26 }
 0x1b6   : > { %v738_v28 = vsub.f32 %v3222_v23, %v737_v27 }
 0x1b8   : > { %v739_v29 = vmul.f32 %v738_v28, %v738_v28 }
 0x1ba   : > { %v740_v30 = vsel %vm732_vm1, %v739_v29, 0.0 }
 0x1bb   : > { %741 = vadd.xlane.f32.xlu0 %v740_v30 }
 0x248   : > { %v742_v34 = vpop.xlane.xlu0 %741 }
 0x249   : > { %v743_v35 = vmul.f32 0.03125, %v742_v34 }
 0x24b   : > { %v744_v36 = vadd.f32 1e-06, %v743_v35 }
 0x24d   : > { %2903 = vrsqrt.f32 %v744_v36 }
 0x257   : > { %v2904_v37 = vpop.eup %2903 }
 0x258   : > { %v746_v39 = vmul.f32 %v2904_v37, %v738_v28 }
 0x25a   : > { %v753_v41 = vmul.f32 %v2491_v38, %v746_v39 }
 0x25c   : > { %v760_v42 = vadd.f32 %v2492_v40, %v753_v41 }
 0x25e   : > { %v761_v43 = vpack.c.bf16 %v760_v42, %v760_v42 }
 0x260   : > { %2651 = vmatmul.mubr.msk.bf16.vlgmr.msra.gmra.mrb[0].mxu1 %vm785_vm3, %v761_v43 }
 0x261   : > { %2656 = vmatprep.mubr.msk.bf16.mxu1 %vm3015_vm2, %v3014_v32 }
 0x333   : > { %v823_v45 = vpop.f32.mrb[0].mxu1 }
 0x334   : > { %v824_v46 = vadd.f32 %v2493_v44, %v823_v45  ;;  %v2652_v47 = vpop.f32.mrb[1].mxu1 }
 0x335   : > { %v826_v48 = vpop.f32.mrb[2].mxu1 }
 0x336   : > { %v3254_v49 = vpack.c.bf16 %v824_v46, %v824_v46  ;;  %v2653_v50 = vpop.f32.mrb[3].mxu1 }
 0x338   : > { %893 = vrot.lane.b32.xlu0 %v3254_v49, %s3646_s1  ;;  %831 = vrot.lane.b32.xlu1 %v3254_v49, %s3017_s23  ;;  %s3647_s1 = smov 24  }
 0x3aa   : > { %v832_v51 = vpop.permute.xlu1 %831  ;;  %v894_v53 = vpop.permute.xlu0 %893 }
 0x3ab   : > { %v838_v52 = vsel %vm833_vm4, %v832_v51, 0  ;;  %v901_v54 = vsel %vm899_vm5, %v894_v53, 0 }
 0x3ac   : > { %2655 = vmatpush3.bf16.xpose.msra.mxu1 %v838_v52 }
 0x3ad   : > { %2660 = vmatprep.subr.bf16.mxu1 %v3014_v32 }
 0x3b3   : > { %2657 = vmatmul.mubr.msk.bf16.vlgmr.msra.gmra.mrb[4].mxu1 %vm833_vm4, %v3254_v49 }
 0x3b4   : > { %2661 = vmatpush3.bf16.msra.mxu1 %v901_v54  ;;  %2662 = vmatprep.mubr.msk.bf16.mxu1 %vm3015_vm2, %v3014_v32 }
 0x3b5   : > { %2666 = vmatprep.subr.bf16.mxu1 %v3014_v32 }
 0x486   : > { %v874_v55 = vpop.f32.mrb[4].mxu1 }
 0x487   : > { %v2658_v56 = vpop.f32.mrb[5].mxu1  ;;  %v881_v57 = vsel %vm880_vm6, %v874_v55, -inf }
 0x488   : > { %882 = vmax.xlane.f32.xlu1 %v881_v57  ;;  %v877_v58 = vpop.f32.mrb[6].mxu1 }
 0x489   : > { %v2659_v59 = vpop.f32.mrb[7].mxu1 }
 0x515   : > { %v883_v60 = vpop.xlane.xlu1 %882 }
 0x516   : > { %v884_v61 = vsub.f32 %v874_v55, %v883_v60 }
 0x518   : > { %v885_v62 = vmul.f32 1.442695, %v884_v61 }
 0x51a   : > { %2905 = vpow2.f32 %v885_v62 }
 0x524   : > { %v2906_v63 = vpop.eup %2905 }
 0x525   : > { %v887_v0 = vsel %vm880_vm6, %v2906_v63, 0.0 }
 0x526   : > { %888 = vadd.xlane.f32.xlu0 %v887_v0 }
 0x53c   : > { %945 = vrot.lane.b32.xlu0 %v3254_v49, %s3018_s21 }
 0x540   : > { %943 = vrot.lane.b32.xlu0 %v3254_v49, %s3019_s24 }
 0x5b3   : > { %v889_v1 = vpop.xlane.xlu0 %888 }
 0x5b4   : > { %2907 = vrcp.f32 %v889_v1 }
 0x5b7   : > { %v946_v4 = vpop.permute.xlu0 %945 }
 0x5b8   : > { %v951_v6 = vsel %vm833_vm4, %v946_v4, 0 }
 0x5bb   : > { %v944_v7 = vpop.permute.xlu0 %943 }
 0x5be   : > { %v2908_v2 = vpop.eup %2907 }
 0x5bf   : > { %v891_v3 = vmul.f32 %v2908_v2, %v2906_v63 }
 0x5c1   : > { %v892_v5 = vpack.c.bf16 %v891_v3, %v891_v3 }
 0x5c3   : > { %2663 = vmatmul.mubr.msk.bf16.vlgmr.msra.gmra.mrb[8].mxu1 %vm895_vm7, %v892_v5 }
 0x5c4   : > { %2667 = vmatpush3.bf16.xpose.msra.mxu1 %v951_v6  ;;  %2668 = vmatprep.mubr.msk.bf16.mxu1 %vm3015_vm2, %v3014_v32 }
 0x5c5   : > { %2672 = vmatprep.subr.bf16.mxu1 %v3014_v32 }
 0x5cb   : > { %2669 = vmatmul.mubr.msk.bf16.vlgmr.msra.gmra.mrb[12].mxu1 %vm833_vm4, %v944_v7 }
 0x5cc   : > { %2674 = vmatprep.mubr.msk.bf16.mxu1 %vm3015_vm2, %v3014_v32 }
 0x696   : > { %v3282_v8 = vpop.f32.mrb[8].mxu1 }
 0x697   : > { %v2664_v9 = vpop.f32.mrb[9].mxu1 }
 0x698   : > { %v940_v10 = vpop.f32.mrb[10].mxu1 }
 0x699   : > { %v2665_v11 = vpop.f32.mrb[11].mxu1 }
 0x69e   : > { %v987_v12 = vpop.f32.mrb[12].mxu1 }
 0x69f   : > { %v2670_v13 = vpop.f32.mrb[13].mxu1  ;;  %v993_v14 = vsel %vm880_vm6, %v987_v12, -inf }
 0x6a0   : > { %994 = vmax.xlane.f32.xlu1 %v993_v14  ;;  %v990_v15 = vpop.f32.mrb[14].mxu1  ;;  %v2885_v13 = vld [vmem:[%s3622_s8] sm:$0xff]   ;;  %v2886_v14 = vld [vmem:[%s3622_s8 + $0x8] sm:$0xff]  }
 0x6a1   : > { %v2671_v16 = vpop.f32.mrb[15].mxu1 }
 0x6b1   : > { %1005 = vrot.lane.b32.xlu1 %v3254_v49, %s3645_s25  ;;  %s3670_s25 = smov 104  }
 0x6b5   : > { %1055 = vrot.lane.b32.xlu1 %v3254_v49, %s3021_s19 }
 0x6b9   : > { %1053 = vrot.lane.b32.xlu1 %v3254_v49, %s3650_s20 }
 0x72d   : > { %v995_v17 = vpop.xlane.xlu1 %994 }
 0x72e   : > { %v996_v18 = vsub.f32 %v987_v12, %v995_v17 }
 0x730   : > { %v997_v19 = vmul.f32 1.442695, %v996_v18 }
 0x731   : > { %v1006_v20 = vpop.permute.xlu1 %1005 }
 0x732   : > { %2909 = vpow2.f32 %v997_v19  ;;  %v1011_v21 = vsel %vm899_vm5, %v1006_v20, 0 }
 0x733   : > { %2673 = vmatpush3.bf16.msra.mxu1 %v1011_v21 }
 0x734   : > { %2678 = vmatprep.subr.bf16.mxu1 %v3014_v32 }
 0x735   : > { %v1056_v28 = vpop.permute.xlu1 %1055 }
 0x736   : > { %v1061_v30 = vsel %vm833_vm4, %v1056_v28, 0 }
 0x739   : > { %v1054_v33 = vpop.permute.xlu1 %1053 }
 0x73c   : > { %v2910_v22 = vpop.eup %2909 }
 0x73d   : > { %v999_v24 = vsel %vm880_vm6, %v2910_v22, 0.0 }
 0x73e   : > { %1000 = vadd.xlane.f32.xlu0 %v999_v24 }
 0x754   : > { %1115 = vrot.lane.b32.xlu0 %v3254_v49, %s3641_s29  ;;  %s3642_s29 = smov 16  }
 0x7cb   : > { %v1001_v25 = vpop.xlane.xlu0 %1000 }
 0x7cc   : > { %2911 = vrcp.f32 %v1001_v25 }
 0x7cf   : > { %v1116_v31 = vpop.permute.xlu0 %1115 }
 0x7d0   : > { %v1121_v34 = vsel %vm899_vm5, %v1116_v31, 0 }
 0x7d6   : > { %v2912_v26 = vpop.eup %2911 }
 0x7d7   : > { %v1003_v27 = vmul.f32 %v2912_v26, %v2910_v22 }
 0x7d9   : > { %v1004_v29 = vpack.c.bf16 %v1003_v27, %v1003_v27  ;;  %v2505_v27 = vld [vmem:[%s3623_s9] ss:$0 sm:$0xff] }
 0x7db   : > { %2675 = vmatmul.mubr.msk.bf16.vlgmr.msra.gmra.mrb[16].mxu1 %vm895_vm7, %v1004_v29 }
 0x7dc   : > { %2679 = vmatpush3.bf16.xpose.msra.mxu1 %v1061_v30  ;;  %2680 = vmatprep.mubr.msk.bf16.mxu1 %vm3015_vm2, %v3014_v32 }
 0x7dd   : > { %2684 = vmatprep.subr.bf16.mxu1 %v3014_v32 }
 0x7e3   : > { %2681 = vmatmul.mubr.msk.bf16.vlgmr.msra.gmra.mrb[20].mxu1 %vm833_vm4, %v1054_v33 }
 0x7e4   : > { %2685 = vmatpush3.bf16.msra.mxu1 %v1121_v34  ;;  %2686 = vmatprep.mubr.msk.bf16.mxu1 %vm3015_vm2, %v3014_v32 }
 0x7e5   : > { %2690 = vmatprep.subr.bf16.mxu1 %v3014_v32 }
 0x8ae   : > { %v1047_v35 = vpop.f32.mrb[16].mxu1 }
 0x8af   : > { %v2676_v36 = vpop.f32.mrb[17].mxu1 }
 0x8b0   : > { %v1050_v37 = vpop.f32.mrb[18].mxu1 }
 0x8b1   : > { %v2677_v38 = vpop.f32.mrb[19].mxu1 }
 0x8b6   : > { %v1097_v39 = vpop.f32.mrb[20].mxu1 }
 0x8b7   : > { %v2682_v40 = vpop.f32.mrb[21].mxu1  ;;  %v1103_v41 = vsel %vm880_vm6, %v1097_v39, -inf }
 0x8b8   : > { %1104 = vmax.xlane.f32.xlu1 %v1103_v41  ;;  %v1100_v42 = vpop.f32.mrb[22].mxu1  ;;  %v2887_v40 = vld [vmem:[%s3626_s12] sm:$0xff]  }
 0x8b9   : > { %v2683_v43 = vpop.f32.mrb[23].mxu1 }
 0x945   : > { %v1105_v44 = vpop.xlane.xlu1 %1104 }
 0x946   : > { %v1106_v45 = vsub.f32 %v1097_v39, %v1105_v44 }
 0x948   : > { %v1107_v46 = vmul.f32 1.442695, %v1106_v45  ;;  %v2509_v45 = vld [vmem:[%s3624_s10] ss:$0 sm:$0xff] }
 0x94a   : > { %2913 = vpow2.f32 %v1107_v46 }
 0x954   : > { %v2914_v47 = vpop.eup %2913 }
 0x955   : > { %v1109_v48 = vsel %vm880_vm6, %v2914_v47, 0.0 }
 0x956   : > { %1110 = vadd.xlane.f32.xlu0 %v1109_v48 }
 0x96c   : > { %1165 = vrot.lane.b32.xlu0 %v3254_v49, %s3649_s22 }
 0x970   : > { %1163 = vrot.lane.b32.xlu0 %v3254_v49, %s3648_s18  ;;  %s3678_s18 = sld [smem:[#allocation15_spill]] }
 0x9e3   : > { %v1111_v50 = vpop.xlane.xlu0 %1110 }
 0x9e4   : > { %2915 = vrcp.f32 %v1111_v50 }
 0x9e7   : > { %v1166_v53 = vpop.permute.xlu0 %1165 }
 0x9e8   : > { %v1171_v55 = vsel %vm833_vm4, %v1166_v53, 0  ;;  %v2890_v53 = vld [vmem:[%s3628_s14 + $0x8] sm:$0xff]  }
 0x9eb   : > { %v1164_v56 = vpop.permute.xlu0 %1163 }
 0x9ee   : > { %v2916_v51 = vpop.eup %2915 }
 0x9ef   : > { %v1113_v52 = vmul.f32 %v2916_v51, %v2914_v47  ;;  %v2510_v47 = vld [vmem:[%s3625_s11] ss:$0 sm:$0xff] }
 0x9f1   : > { %v1114_v54 = vpack.c.bf16 %v1113_v52, %v1113_v52  ;;  %v2889_v52 = vld [vmem:[%s3628_s14] sm:$0xff]  }
 0x9f3   : > { %2687 = vmatmul.mubr.msk.bf16.vlgmr.msra.gmra.mrb[24].mxu1 %vm895_vm7, %v1114_v54  ;;  %v2891_v54 = vld [vmem:[%s3628_s14 + $0x10] sm:$0xff]  }
 0x9f4   : > { %2691 = vmatpush3.bf16.xpose.msra.mxu1 %v1171_v55  ;;  %2692 = vmatprep.mubr.msk.bf16.mxu1 %vm3015_vm2, %v3014_v32  ;;  %v2892_v55 = vld [vmem:[%s3628_s14 + $0x18] sm:$0xff]  }
 0x9f5   : > { %2702 = vmatprep.subr.bf16.mxu1 %v3014_v32 }
 0x9fb   : > { %2693 = vmatmul.mubr.msk.bf16.vlgmr.msra.gmra.mrb[28].mxu1 %vm833_vm4, %v1164_v56  ;;  %v2511_v56 = vld [vmem:[%s3627_s13] ss:$0 sm:$0xff] }
 0x9fc   : > { %2706 = vmatprep.mubr.msk.bf16.mxu1 %vm3015_vm2, %v3014_v32  ;;  %2703 = vmatpush3.bf16.msra.mxu1 %v2885_v13 }
 0x9fd   : > { %2704 = vmatprep.subr.bf16.mxu1 %v3014_v32 }
 0xa00   : > { %2705 = vmatpush3.bf16.msra.mxu1 %v2886_v14 }
 0xa01   : > { %2718 = vmatprep.subr.bf16.mxu1 %v3014_v32 }
 0xac6   : > { %v1157_v57 = vpop.f32.mrb[24].mxu1 }
 0xac7   : > { %v2688_v58 = vpop.f32.mrb[25].mxu1 }
 0xac8   : > { %v1160_v59 = vpop.f32.mrb[26].mxu1 }
 0xac9   : > { %v2689_v60 = vpop.f32.mrb[27].mxu1 }
 0xace   : > { %v1207_v61 = vpop.f32.mrb[28].mxu1 }
 0xacf   : > { %v2694_v62 = vpop.f32.mrb[29].mxu1  ;;  %v1213_v63 = vsel %vm880_vm6, %v1207_v61, -inf }
 0xad0   : > { %1214 = vmax.xlane.f32.xlu1 %v1213_v63  ;;  %v1210_v0 = vpop.f32.mrb[30].mxu1 }
 0xad1   : > { %v2695_v1 = vpop.f32.mrb[31].mxu1 }
 0xae1   : > { %1225 = vrot.lane.b32.xlu1 %v3254_v49, %s3644_s30  ;;  %s3668_s30 = smov 112  }
 0xae5   : > { %1274 = vrot.lane.b32.xlu1 %v1047_v35, %s3643_s27  ;;  %s3669_s27 = smov 72  }
 0xae9   : > { %1278 = vrot.lane.b32.xlu1 %v1157_v57, %s3642_s29  ;;  %s3675_s29 = smov 8  }
 0xb5d   : > { %v1215_v2 = vpop.xlane.xlu1 %1214 }
 0xb5e   : > { %v1216_v3 = vsub.f32 %v1207_v61, %v1215_v2 }
 0xb60   : > { %v1217_v4 = vmul.f32 1.442695, %v1216_v3 }
 0xb61   : > { %v1226_v5 = vpop.permute.xlu1 %1225 }
 0xb62   : > { %2917 = vpow2.f32 %v1217_v4  ;;  %v1231_v6 = vsel %vm899_vm5, %v1226_v5, 0 }
 0xb63   : > { %2697 = vmatpush3.bf16.msra.mxu0 %v1231_v6 }
 0xb64   : > { %2710 = vmatprep.subr.bf16.mxu0 %v3014_v32 }
 0xb65   : > { %v1275_v19 = vpop.permute.xlu1 %1274 }
 0xb66   : > { %v1285_v21 = vsel %vm833_vm4, %v3282_v8, %v1275_v19 }
 0xb69   : > { %v1279_v20 = vpop.permute.xlu1 %1278 }
 0xb6a   : > { %v1287_v22 = vsel %vm1286_vm8, %v1285_v21, %v1279_v20  ;;  %v2893_v21 = vld [vmem:[%s3620_s6 + $0x10] sm:$0xff]  }
 0xb6c   : > { %v2918_v7 = vpop.eup %2917 }
 0xb6d   : > { %v1219_v9 = vsel %vm880_vm6, %v2918_v7, 0.0 }
 0xb6e   : > { %1220 = vadd.xlane.f32.xlu0 %v1219_v9  ;;  %v2515_v9 = vld [vmem:[%s3629_s15] ss:$0 sm:$0xff] }
 0xbfb   : > { %v1221_v49 = vpop.xlane.xlu0 %1220 }
 0xbfc   : > { %2919 = vrcp.f32 %v1221_v49 }
 0xc06   : > { %v2920_v10 = vpop.eup %2919 }
 0xc07   : > { %v1223_v11 = vmul.f32 %v2920_v10, %v2918_v7 }
 0xc09   : > { %v1224_v12 = vpack.c.bf16 %v1223_v11, %v1223_v11 }
 0xc0b   : > { %2699 = vmatmul.mubr.msk.bf16.vlgmr.msra.gmra.mrb[4].mxu0 %vm895_vm7, %v1224_v12 }
 0xc0c   : > { %2714 = vmatprep.mubr.msk.bf16.mxu0 %vm3015_vm2, %v3014_v32  ;;  %2711 = vmatpush3.bf16.msra.mxu0 %v2887_v40 }
 0xc0d   : > { %2712 = vmatprep.subr.bf16.mxu0 %v3014_v32 }
 0xcde   : > { %v1267_v15 = vpop.f32.mrb[4].mxu0 }
 0xcdf   : > { %1282 = vrot.lane.b32.xlu1 %v1267_v15, %s3647_s1  ;;  %v2700_v16 = vpop.f32.mrb[5].mxu0 }
 0xce0   : > { %v1270_v17 = vpop.f32.mrb[6].mxu0 }
 0xce1   : > { %v2701_v18 = vpop.f32.mrb[7].mxu0 }
 0xd51   : > { %v1283_v24 = vpop.permute.xlu1 %1282 }
 0xd52   : > { %v1289_v25 = vsel %vm1288_vm9, %v1287_v22, %v1283_v24  ;;  %v2894_v22 = vld [vmem:[%s3620_s6 + $0x18] sm:$0xff]  }
 0xd53   : > { %v1290_v26 = vpack.c.bf16 %v1289_v25, %v1289_v25 }
 0xd55   : > { %2707 = vmatmul.mubr.msk.bf16.vlgmr.msra.gmra.mrb[32].mxu1 %vm785_vm3, %v1290_v26 }
 0xd56   : > { %2726 = vmatprep.mubr.msk.bf16.mxu1 %vm3015_vm2, %v3014_v32  ;;  %2719 = vmatpush3.bf16.msra.mxu1 %v2889_v52 }
 0xd57   : > { %2720 = vmatprep.subr.bf16.mxu1 %v3014_v32 }
 0xd5a   : > { %2721 = vmatpush3.bf16.msra.mxu1 %v2890_v53 }
 0xd5b   : > { %2722 = vmatprep.subr.bf16.mxu1 %v3014_v32 }
 0xd5e   : > { %2723 = vmatpush3.bf16.msra.mxu1 %v2891_v54 }
 0xd5f   : > { %2724 = vmatprep.subr.bf16.mxu1 %v3014_v32 }
 0xd62   : > { %2725 = vmatpush3.bf16.msra.mxu1 %v2892_v55 }
 0xd63   : > { %2744 = vmatprep.subr.bf16.mxu1 %v3014_v32 }
 0xe28   : > { %v1351_v28 = vpop.f32.mrb[32].mxu1 }
 0xe29   : > { %v1352_v29 = vadd.f32 %v2505_v27, %v1351_v28  ;;  %v2708_v30 = vpop.f32.mrb[33].mxu1  ;;  %v2523_v28 = vld [vmem:[%s3618_s4 + $0x1] ss:$0 sm:$0xff] }
 0xe2a   : > { %v1354_v31 = vpop.f32.mrb[34].mxu1  ;;  %v2524_v30 = vld [vmem:[%s3619_s5 + $0x1] ss:$0 sm:$0xff] }
 0xe2b   : > { %v3351_v8 = vadd.f32 %v1352_v29, %v3222_v23  ;;  %v2709_v33 = vpop.f32.mrb[35].mxu1  ;;  %v2888_v23 = vld [vmem:[%s3626_s12 + $0x8] sm:$0xff]  }
 0xe2c   : > { %2713 = vmatpush3.bf16.msra.mxu0 %v2888_v23 }
 0xe2d   : > { %v1360_v34 = vsel %vm732_vm1, %v3351_v8, 0.0  ;;  %2730 = vmatprep.subr.bf16.mxu0 %v3014_v32 }
 0xe2e   : > { %1361 = vadd.xlane.f32.xlu0 %v1360_v34  ;;  %v2530_v34 = vld [vmem:[%s3621_s7 + $0x1] ss:$0 sm:$0xff] }
 0xebb   : > { %v1362_v35 = vpop.xlane.xlu0 %1361 }
 0xebc   : > { %v1363_v36 = vmul.f32 0.03125, %v1362_v35 }
 0xebe   : > { %v1364_v37 = vsub.f32 %v3351_v8, %v1363_v36 }
 0xec0   : > { %v1365_v38 = vmul.f32 %v1364_v37, %v1364_v37 }
 0xec2   : > { %v1366_v39 = vsel %vm732_vm1, %v1365_v38, 0.0 }
 0xec3   : > { %1367 = vadd.xlane.f32.xlu1 %v1366_v39 }
 0xf50   : > { %v1368_v41 = vpop.xlane.xlu1 %1367 }
 0xf51   : > { %v1369_v42 = vmul.f32 0.03125, %v1368_v41 }
 0xf53   : > { %v1370_v43 = vadd.f32 1e-06, %v1369_v42 }
 0xf55   : > { %2921 = vrsqrt.f32 %v1370_v43 }
 0xf5f   : > { %v2922_v44 = vpop.eup %2921 }
 0xf60   : > { %v1372_v46 = vmul.f32 %v2922_v44, %v1364_v37 }
 0xf62   : > { %v1379_v48 = vmul.f32 %v2509_v45, %v1372_v46 }
 0xf64   : > { %v1386_v50 = vadd.f32 %v2510_v47, %v1379_v48 }
 0xf66   : > { %v1387_v51 = vpack.c.bf16 %v1386_v50, %v1386_v50 }
 0xf68   : > { %2715 = vmatmul.mubr.msk.bf16.vlgmr.msra.gmra.mrb[8].mxu0 %vm785_vm3, %v1387_v51 }
 0xf69   : > { %2734 = vmatprep.mubr.msk.bf16.mxu0 %vm3015_vm2, %v3014_v32  ;;  %2731 = vmatpush3.bf16.msra.mxu0 %v2893_v21 }
 0xf6a   : > { %2732 = vmatprep.subr.bf16.mxu0 %v3014_v32 }
 0xf6d   : > { %2733 = vmatpush3.bf16.msra.mxu0 %v2894_v22 }
 0xf6e   : > { %2738 = vmatprep.subr.bf16.mxu0 %v3014_v32 }
0x103b   : > { %v1448_v57 = vpop.f32.mrb[8].mxu0 }
0x103c   : > { %v1449_v58 = vadd.f32 %v2511_v56, %v1448_v57  ;;  %v2716_v59 = vpop.f32.mrb[9].mxu0 }
0x103d   : > { %v1451_v60 = vpop.f32.mrb[10].mxu0 }
0x103e   : > { %v1455_v61 = vmul.f32 0.044715, %v1449_v58  ;;  %v2717_v62 = vpop.f32.mrb[11].mxu0  ;;  %v1454_v4 = vmul.f32 0.5, %v1449_v58 }
0x1040   : > { %v1456_v63 = vmul.f32 %v1455_v61, %v1449_v58 }
0x1042   : > { %v1457_v0 = vmul.f32 %v1456_v63, %v1449_v58 }
0x1044   : > { %v1458_v1 = vadd.f32 %v1457_v0, %v1449_v58 }
0x1046   : > { %v1459_v2 = vmul.f32 0.7978846, %v1458_v1 }
0x1048   : > { %2923 = vtanh.f32 %v1459_v2 }
0x1052   : > { %v2924_v3 = vpop.eup %2923 }
0x1053   : > { %v1461_v5 = vadd.f32 1.0, %v2924_v3 }
0x1055   : > { %v1462_v6 = vmul.f32 %v1461_v5, %v1454_v4 }
0x1057   : > { %v1463_v7 = vpack.c.bf16 %v1462_v6, %v1462_v6 }
0x1059   : > { %2727 = vmatmul.mubr.msk.bf16.vlgmr.msra.gmra.mrb[36].mxu1 %vm684_vm0, %v1463_v7 }
0x105a   : > { %2746 = vmatprep.mubr.msk.bf16.mxu1 %vm3015_vm2, %v3014_v32 }
0x112c   : > { %v1540_v49 = vpop.f32.mrb[36].mxu1 }
0x112d   : > { %v1541_v10 = vadd.f32 %v2515_v9, %v1540_v49  ;;  %v2728_v11 = vpop.f32.mrb[37].mxu1 }
0x112e   : > { %v1543_v12 = vpop.f32.mrb[38].mxu1 }
0x112f   : > { %v3400_v13 = vadd.f32 %v1541_v10, %v3351_v8  ;;  %v2729_v14 = vpop.f32.mrb[39].mxu1 }
0x1131   : > { %v1551_v15 = vsel %vm732_vm1, %v3400_v13, 0.0 }
0x1132   : > { %1552 = vadd.xlane.f32.xlu0 %v1551_v15 }
0x11bf   : > { %v1553_v16 = vpop.xlane.xlu0 %1552 }
0x11c0   : > { %v1554_v17 = vmul.f32 0.03125, %v1553_v16 }
0x11c2   : > { %v1555_v18 = vsub.f32 %v3400_v13, %v1554_v17 }
0x11c4   : > { %v1556_v19 = vmul.f32 %v1555_v18, %v1555_v18 }
0x11c6   : > { %v1557_v20 = vsel %vm732_vm1, %v1556_v19, 0.0 }
0x11c7   : > { %1558 = vadd.xlane.f32.xlu0 %v1557_v20 }
0x1254   : > { %v1559_v24 = vpop.xlane.xlu0 %1558 }
0x1255   : > { %v1560_v25 = vmul.f32 0.03125, %v1559_v24 }
0x1257   : > { %v1561_v26 = vadd.f32 1e-06, %v1560_v25 }
0x1259   : > { %2925 = vrsqrt.f32 %v1561_v26 }
0x1263   : > { %v2926_v27 = vpop.eup %2925 }
0x1264   : > { %v1563_v29 = vmul.f32 %v2926_v27, %v1555_v18 }
0x1266   : > { %v1570_v31 = vmul.f32 %v2523_v28, %v1563_v29 }
0x1268   : > { %v1577_v8 = vadd.f32 %v2524_v30, %v1570_v31 }
0x126a   : > { %v1578_v33 = vpack.c.bf16 %v1577_v8, %v1577_v8 }
0x126c   : > { %2735 = vmatmul.mubr.msk.bf16.vlgmr.msra.gmra.mrb[12].mxu0 %vm785_vm3, %v1578_v33 }
0x126d   : > { %2740 = vmatprep.mubr.msk.bf16.mxu0 %vm3015_vm2, %v3014_v32 }
0x133f   : > { %v1641_v35 = vpop.f32.mrb[12].mxu0 }
0x1340   : > { %v1642_v36 = vadd.f32 %v2530_v34, %v1641_v35  ;;  %v2736_v37 = vpop.f32.mrb[13].mxu0 }
0x1341   : > { %v1644_v38 = vpop.f32.mrb[14].mxu0 }
0x1342   : > { %v3426_v39 = vpack.c.bf16 %v1642_v36, %v1642_v36  ;;  %v2737_v40 = vpop.f32.mrb[15].mxu0 }
0x1344   : > { %1757 = vrot.lane.b32.xlu1 %v3426_v39, %s3019_s24  ;;  %1649 = vrot.lane.b32.xlu0 %v3426_v39, %s3017_s23  ;;  %s3671_s23 = smov 64   ;;  %s3673_s24 = smov 48  }
0x1348   : > { %1759 = vrot.lane.b32.xlu0 %v3426_v39, %s3018_s21  ;;  %s3672_s21 = smov 56  }
0x134c   : > { %1869 = vrot.lane.b32.xlu0 %v3426_v39, %s3021_s19  ;;  %s3674_s19 = smov 40  }
0x1350   : > { %1867 = vrot.lane.b32.xlu0 %v3426_v39, %s3668_s30  ;;  %s3676_s30 = smov 16  }
0x1354   : > { %1979 = vrot.lane.b32.xlu0 %v3426_v39, %s3669_s27  ;;  %s3677_s27 = smov 24  }
0x1358   : > { %1977 = vrot.lane.b32.xlu0 %v3426_v39, %s3670_s25 }
0x13b6   : > { %v1650_v23 = vpop.permute.xlu0 %1649  ;;  %v1758_v45 = vpop.permute.xlu1 %1757 }
0x13b7   : > { %v1655_v41 = vsel %vm833_vm4, %v1650_v23, 0 }
0x13b8   : > { %2739 = vmatpush3.bf16.xpose.msra.mxu0 %v1655_v41 }
0x13b9   : > { %2750 = vmatprep.subr.bf16.mxu0 %v3014_v32 }
0x13ba   : > { %v1760_v42 = vpop.permute.xlu0 %1759 }
0x13bb   : > { %v1765_v43 = vsel %vm833_vm4, %v1760_v42, 0 }
0x13be   : > { %v1870_v44 = vpop.permute.xlu0 %1869 }
0x13bf   : > { %2741 = vmatmul.mubr.msk.bf16.vlgmr.msra.gmra.mrb[16].mxu0 %vm833_vm4, %v3426_v39  ;;  %v1875_v47 = vsel %vm833_vm4, %v1870_v44, 0 }
0x13c0   : > { %2751 = vmatpush3.bf16.xpose.msra.mxu0 %v1765_v43  ;;  %2752 = vmatprep.mubr.msk.bf16.mxu0 %vm3015_vm2, %v3014_v32 }
0x13c1   : > { %2762 = vmatprep.subr.bf16.mxu0 %v3014_v32 }
0x13c2   : > { %v1868_v46 = vpop.permute.xlu0 %1867 }
0x13c6   : > { %v1980_v48 = vpop.permute.xlu0 %1979 }
0x13c7   : > { %2753 = vmatmul.mubr.msk.bf16.vlgmr.msra.gmra.mrb[20].mxu0 %vm833_vm4, %v1758_v45  ;;  %v1985_v50 = vsel %vm833_vm4, %v1980_v48, 0 }
0x13c8   : > { %2763 = vmatpush3.bf16.xpose.msra.mxu0 %v1875_v47  ;;  %2764 = vmatprep.mubr.msk.bf16.mxu0 %vm3015_vm2, %v3014_v32 }
0x13c9   : > { %2774 = vmatprep.subr.bf16.mxu0 %v3014_v32 }
0x13ca   : > { %v1978_v51 = vpop.permute.xlu0 %1977 }
0x13cf   : > { %2765 = vmatmul.mubr.msk.bf16.vlgmr.msra.gmra.mrb[24].mxu0 %vm833_vm4, %v1868_v46 }
0x13d0   : > { %2775 = vmatpush3.bf16.xpose.msra.mxu0 %v1985_v50  ;;  %2776 = vmatprep.mubr.msk.bf16.mxu0 %vm3015_vm2, %v3014_v32 }
0x13d1   : > { %2786 = vmatprep.subr.bf16.mxu0 %v3014_v32 }
0x13d7   : > { %2777 = vmatmul.mubr.msk.bf16.vlgmr.msra.gmra.mrb[28].mxu0 %vm833_vm4, %v1978_v51 }
0x13d8   : > { %2790 = vmatprep.mubr.msk.bf16.mxu0 %vm3015_vm2, %v3014_v32 }
0x1492   : > { %v1691_v52 = vpop.f32.mrb[16].mxu0 }
0x1493   : > { %v2742_v53 = vpop.f32.mrb[17].mxu0  ;;  %v1697_v54 = vsel %vm880_vm6, %v1691_v52, -inf }
0x1494   : > { %1698 = vmax.xlane.f32.xlu1 %v1697_v54  ;;  %v1694_v55 = vpop.f32.mrb[18].mxu0 }
0x1495   : > { %v2743_v56 = vpop.f32.mrb[19].mxu0 }
0x149a   : > { %v1801_v57 = vpop.f32.mrb[20].mxu0 }
0x149b   : > { %v2754_v58 = vpop.f32.mrb[21].mxu0  ;;  %v1807_v59 = vsel %vm880_vm6, %v1801_v57, -inf }
0x149c   : > { %1808 = vmax.xlane.f32.xlu0 %v1807_v59  ;;  %v1804_v60 = vpop.f32.mrb[22].mxu0 }
0x149d   : > { %v2755_v61 = vpop.f32.mrb[23].mxu0 }
0x14a2   : > { %v1911_v62 = vpop.f32.mrb[24].mxu0 }
0x14a3   : > { %v2766_v63 = vpop.f32.mrb[25].mxu0  ;;  %v1917_v0 = vsel %vm880_vm6, %v1911_v62, -inf }
0x14a4   : > { %1918 = vmax.xlane.f32.xlu0 %v1917_v0  ;;  %v1914_v1 = vpop.f32.mrb[26].mxu0  ;;  %v2896_v63 = vld [vmem:[%s3622_s8 + $0x18] sm:$0xff]  }
0x14a5   : > { %v2767_v2 = vpop.f32.mrb[27].mxu0 }
0x14aa   : > { %v2021_v3 = vpop.f32.mrb[28].mxu0 }
0x14ab   : > { %v2778_v4 = vpop.f32.mrb[29].mxu0  ;;  %v2027_v5 = vsel %vm880_vm6, %v2021_v3, -inf }
0x14ac   : > { %2028 = vmax.xlane.f32.xlu0 %v2027_v5  ;;  %v2024_v6 = vpop.f32.mrb[30].mxu0 }
0x14ad   : > { %v2779_v7 = vpop.f32.mrb[31].mxu0 }
0x1521   : > { %v1699_v9 = vpop.xlane.xlu1 %1698 }
0x1522   : > { %v1700_v49 = vsub.f32 %v1691_v52, %v1699_v9 }
0x1524   : > { %v1701_v10 = vmul.f32 1.442695, %v1700_v49 }
0x1526   : > { %2927 = vpow2.f32 %v1701_v10 }
0x1529   : > { %v1809_v11 = vpop.xlane.xlu0 %1808 }
0x152a   : > { %v1810_v12 = vsub.f32 %v1801_v57, %v1809_v11 }
0x152c   : > { %v1811_v14 = vmul.f32 1.442695, %v1810_v12 }
0x152e   : > { %2929 = vpow2.f32 %v1811_v14 }
0x1530   : > { %v2928_v15 = vpop.eup %2927 }
0x1531   : > { %v1703_v16 = vsel %vm880_vm6, %v2928_v15, 0.0  ;;  %v1919_v17 = vpop.xlane.xlu0 %1918 }
0x1532   : > { %1704 = vadd.xlane.f32.xlu1 %v1703_v16  ;;  %v1920_v26 = vsub.f32 %v1911_v62, %v1919_v17  ;;  %v2895_v62 = vld [vmem:[%s3622_s8 + $0x10] sm:$0xff]   ;;  %v2547_v16 = vld [vmem:[%s3623_s9 + $0x1] ss:$0 sm:$0xff] }
0x1533   : > { %2787 = vmatpush3.bf16.msra.mxu0 %v2895_v62 }
0x1534   : > { %v1921_v27 = vmul.f32 1.442695, %v1920_v26  ;;  %2788 = vmatprep.subr.bf16.mxu0 %v3014_v32 }
0x1537   : > { %2789 = vmatpush3.bf16.msra.mxu0 %v2896_v63 }
0x1538   : > { %v2930_v18 = vpop.eup %2929  ;;  %2802 = vmatprep.subr.bf16.mxu0 %v3014_v32 }
0x1539   : > { %v2029_v19 = vpop.xlane.xlu0 %2028  ;;  %v1813_v20 = vsel %vm880_vm6, %v2930_v18, 0.0 }
0x153a   : > { %v2030_v21 = vsub.f32 %v2021_v3, %v2029_v19  ;;  %1814 = vadd.xlane.f32.xlu0 %v1813_v20 }
0x153c   : > { %v2031_v22 = vmul.f32 1.442695, %v2030_v21 }
0x153e   : > { %2931 = vpow2.f32 %v2031_v22 }
0x153f   : > { %2933 = vpow2.f32 %v1921_v27 }
0x1543   : > { %1709 = vrot.lane.b32.xlu1 %v3426_v39, %s3671_s23 }
0x1548   : > { %v2932_v24 = vpop.eup %2931 }
0x1549   : > { %v2033_v25 = vsel %vm880_vm6, %v2932_v24, 0.0  ;;  %v2934_v28 = vpop.eup %2933 }
0x154a   : > { %2034 = vadd.xlane.f32.xlu0 %v2033_v25  ;;  %v1923_v29 = vsel %vm880_vm6, %v2934_v28, 0.0 }
0x1560   : > { %1819 = vrot.lane.b32.xlu0 %v3426_v39, %s3672_s21 }
0x1567   : > { %1924 = vadd.xlane.f32.xlu1 %v1923_v29 }
0x1578   : > { %1929 = vrot.lane.b32.xlu1 %v3426_v39, %s3673_s24 }
0x157c   : > { %2039 = vrot.lane.b32.xlu1 %v3426_v39, %s3674_s19  ;;  %s2582_s19 = sshll.u32 %s3147_s0, 6  ;;  %s3030_s0 = smov [#allocation2]  }
0x157d   : > { %s3571_s3 = scalar_lea.hbm %s3678_s18, %s2582_s19 }
0x15bf   : > { %v1705_v30 = vpop.xlane.xlu1 %1704 }
0x15c0   : > { %2935 = vrcp.f32 %v1705_v30  ;;  %v2897_v30 = vld [vmem:[%s3626_s12 + $0x10] sm:$0xff]  }
0x15c3   : > { %v1710_v31 = vpop.permute.xlu1 %1709 }
0x15c4   : > { %v1715_v8 = vsel %vm899_vm5, %v1710_v31, 0 }
0x15c5   : > { %2745 = vmatpush3.bf16.msra.mxu1 %v1715_v8 }
0x15c6   : > { %2756 = vmatprep.subr.bf16.mxu1 %v3014_v32 }
0x15c7   : > { %v1815_v34 = vpop.xlane.xlu0 %1814 }
0x15c8   : > { %2937 = vrcp.f32 %v1815_v34 }
0x15ca   : > { %v2936_v33 = vpop.eup %2935 }
0x15cb   : > { %v1707_v35 = vmul.f32 %v2936_v33, %v2928_v15 }
0x15cd   : > { %v1708_v36 = vpack.c.bf16 %v1707_v35, %v1707_v35  ;;  %v2553_v35 = vld [vmem:[%s3624_s10 + $0x1] ss:$0 sm:$0xff] }
0x15cf   : > { %2747 = vmatmul.mubr.msk.bf16.vlgmr.msra.gmra.mrb[40].mxu1 %vm895_vm7, %v1708_v36 }
0x15d0   : > { %2758 = vmatprep.mubr.msk.bf16.mxu1 %vm3015_vm2, %v3014_v32 }
0x15d2   : > { %v2938_v37 = vpop.eup %2937 }
0x15d3   : > { %v1817_v39 = vmul.f32 %v2938_v37, %v2930_v18  ;;  %v2554_v37 = vld [vmem:[%s3625_s11 + $0x1] ss:$0 sm:$0xff] }
0x15d5   : > { %v1818_v41 = vpack.c.bf16 %v1817_v39, %v1817_v39 }
0x15d7   : > { %v2035_v38 = vpop.xlane.xlu0 %2034 }
0x15db   : > { %v1820_v40 = vpop.permute.xlu0 %1819 }
0x15dc   : > { %v1825_v23 = vsel %vm899_vm5, %v1820_v40, 0 }
0x15dd   : > { %2757 = vmatpush3.bf16.msra.mxu1 %v1825_v23  ;;  %v2899_v23 = vld [vmem:[%s3628_s14 + $0x20] sm:$0xff]  }
0x15de   : > { %2768 = vmatprep.subr.bf16.mxu1 %v3014_v32 }
0x15e0   : > { %2759 = vmatmul.mubr.msk.bf16.vlgmr.msra.gmra.mrb[44].mxu1 %vm895_vm7, %v1818_v41  ;;  %v2900_v41 = vld [vmem:[%s3628_s14 + $0x28] sm:$0xff]  }
0x15e1   : > { %2770 = vmatprep.mubr.msk.bf16.mxu1 %vm3015_vm2, %v3014_v32 }
0x15f4   : > { %v1925_v42 = vpop.xlane.xlu1 %1924 }
0x15f5   : > { %2939 = vrcp.f32 %v1925_v42  ;;  %v2901_v42 = vld [vmem:[%s3628_s14 + $0x30] sm:$0xff]  }
0x15f6   : > { %2941 = vrcp.f32 %v2035_v38 }
0x15f8   : > { %v1930_v43 = vpop.permute.xlu1 %1929 }
0x15f9   : > { %v1935_v44 = vsel %vm899_vm5, %v1930_v43, 0  ;;  %v2902_v43 = vld [vmem:[%s3628_s14 + $0x38] sm:$0xff]  }
0x15fa   : > { %2769 = vmatpush3.bf16.msra.mxu1 %v1935_v44  ;;  %v2560_v44 = vld [vmem:[%s3627_s13 + $0x1] ss:$0 sm:$0xff] }
0x15fb   : > { %2780 = vmatprep.subr.bf16.mxu1 %v3014_v32 }
0x15fc   : > { %v2040_v47 = vpop.permute.xlu1 %2039 }
0x15fd   : > { %v2045_v51 = vsel %vm899_vm5, %v2040_v47, 0 }
0x15ff   : > { %v2940_v45 = vpop.eup %2939 }
0x1600   : > { %v1927_v46 = vmul.f32 %v2940_v45, %v2934_v28  ;;  %v2942_v50 = vpop.eup %2941 }
0x1601   : > { %v2037_v52 = vmul.f32 %v2942_v50, %v2932_v24 }
0x1602   : > { %v1928_v48 = vpack.c.bf16 %v1927_v46, %v1927_v46 }
0x1603   : > { %v2038_v53 = vpack.c.bf16 %v2037_v52, %v2037_v52 }
0x1604   : > { %2771 = vmatmul.mubr.msk.bf16.vlgmr.msra.gmra.mrb[48].mxu1 %vm895_vm7, %v1928_v48 }
0x1605   : > { %2781 = vmatpush3.bf16.msra.mxu1 %v2045_v51  ;;  %2782 = vmatprep.mubr.msk.bf16.mxu1 %vm3015_vm2, %v3014_v32 }
0x1606   : > { %2794 = vmatprep.subr.bf16.mxu1 %v3014_v32 }
0x160c   : > { %2783 = vmatmul.mubr.msk.bf16.vlgmr.msra.gmra.mrb[52].mxu1 %vm895_vm7, %v2038_v53 }
0x160d   : > { %2798 = vmatprep.mubr.msk.bf16.mxu1 %vm3015_vm2, %v3014_v32  ;;  %2795 = vmatpush3.bf16.msra.mxu1 %v2897_v30 }
0x160e   : > { %2796 = vmatprep.subr.bf16.mxu1 %v3014_v32 }
0x16a2   : > { %v1751_v54 = vpop.f32.mrb[40].mxu1 }
0x16a3   : > { %v2748_v55 = vpop.f32.mrb[41].mxu1 }
0x16a4   : > { %v1754_v56 = vpop.f32.mrb[42].mxu1 }
0x16a5   : > { %v2749_v57 = vpop.f32.mrb[43].mxu1 }
0x16b3   : > { %v1861_v58 = vpop.f32.mrb[44].mxu1 }
0x16b4   : > { %2088 = vrot.lane.b32.xlu1 %v1861_v58, %s3675_s29  ;;  %v2760_v59 = vpop.f32.mrb[45].mxu1 }
0x16b5   : > { %v1864_v60 = vpop.f32.mrb[46].mxu1 }
0x16b6   : > { %v2761_v61 = vpop.f32.mrb[47].mxu1  ;;  %v2573_v60 = vld [vmem:[%s3629_s15 + $0x1] ss:$0 sm:$0xff] }
0x16d7   : > { %v1971_v0 = vpop.f32.mrb[48].mxu1 }
0x16d8   : > { %2092 = vrot.lane.b32.xlu0 %v1971_v0, %s3676_s30  ;;  %v2772_v1 = vpop.f32.mrb[49].mxu1  ;;  %s566_s30 = sand.u32 1, %s3003_s28  }
0x16d9   : > { %v1974_v2 = vpop.f32.mrb[50].mxu1  ;;  %s2398_s25 = scalar_lea.sflag [#allocation3], %s566_s30 }
0x16da   : > { %v2773_v3 = vpop.f32.mrb[51].mxu1 }
0x16df   : > { %v2081_v4 = vpop.f32.mrb[52].mxu1 }
0x16e0   : > { %2096 = vrot.lane.b32.xlu1 %v2081_v4, %s3677_s27  ;;  %v2784_v5 = vpop.f32.mrb[53].mxu1  ;;  %s2474_s27 = sshll.u32 %s566_s30, 2 }
0x16e1   : > { %v2084_v6 = vpop.f32.mrb[54].mxu1  ;;  %s568_s29 = scalar_lea.vmem [#allocation2], %s2474_s27  ;;  %s2953_s27 = sshll.u32 %s3030_s0, 4  ;;  %s2954_s27 = int_to_ptr.vmem [resolvable:$false] %s2953_s27 }
0x16e2   : > { %v2785_v7 = vpop.f32.mrb[55].mxu1  ;;  %s2411_s20 = sshll.u32 %s568_s29, 4  ;;  %s2955_s21 = scalar_lea.vmem %s2954_s27, 128  ;;  %s3573_s20 = int_to_ptr.vmem [resolvable:$true] %s2411_s20 }
0x16e3   : > { %s2949_s23 = scalar_lea.vmem %s3573_s20, 64  ;;  %p2956_p0 = scmp.lt.s32.totalorder %s3573_s20, %s2954_s27 }
0x16e4   : > { %p2950_p11 = scmp.ne.s32.totalorder %s3573_s20, %s2949_s23  ;;  %p2957_p1 = scmp.lt.s32.totalorder %s2955_s21, %s2949_s23 }
0x16e6   : > { %p2951_p12 = pnand %p2950_p11, %p3164_p5  ;;  %p2958_p2 = por %p2957_p1, %p2956_p0 }
0x16e8   : > { %p2952_p13 = pneg %p2951_p12 }
0x16ea   : > { %p2959_p3 = pnand %p2958_p2, %p2952_p13 }
0x1726   : > { %v2089_v9 = vpop.permute.xlu1 %2088 }
0x1727   : > { %v2099_v10 = vsel %vm833_vm4, %v1751_v54, %v2089_v9 }
0x174a   : > { %v2093_v49 = vpop.permute.xlu0 %2092 }
0x174b   : > { %v2100_v11 = vsel %vm1286_vm8, %v2099_v10, %v2093_v49 }
0x1752   : > { %v2097_v12 = vpop.permute.xlu1 %2096 }
0x1753   : > { %v2101_v14 = vsel %vm1288_vm9, %v2100_v11, %v2097_v12 }
0x1754   : > { %v2102_v15 = vpack.c.bf16 %v2101_v14, %v2101_v14  ;;  %v2579_v14 = vld [vmem:[%s3630_s16] ss:$0 sm:$0xff] }
0x1756   : > { %2791 = vmatmul.mubr.msk.bf16.vlgmr.msra.gmra.mrb[32].mxu0 %vm785_vm3, %v2102_v15 }
0x1757   : > { %2810 = vmatprep.mubr.msk.bf16.mxu0 %vm3015_vm2, %v3014_v32  ;;  %2803 = vmatpush3.bf16.msra.mxu0 %v2899_v23 }
0x1758   : > { %2804 = vmatprep.subr.bf16.mxu0 %v3014_v32 }
0x175b   : > { %2805 = vmatpush3.bf16.msra.mxu0 %v2900_v41 }
0x175c   : > { %2806 = vmatprep.subr.bf16.mxu0 %v3014_v32 }
0x175f   : > { %2807 = vmatpush3.bf16.msra.mxu0 %v2901_v42 }
0x1760   : > { %2808 = vmatprep.subr.bf16.mxu0 %v3014_v32 }
0x1763   : > { %2809 = vmatpush3.bf16.msra.mxu0 %v2902_v43 }
0x1829   : > { %v2165_v17 = vpop.f32.mrb[32].mxu0 }
0x182a   : > { %v2166_v18 = vadd.f32 %v2547_v16, %v2165_v17  ;;  %v2792_v19 = vpop.f32.mrb[33].mxu0  ;;  %v2580_v16 = vld [vmem:[%s3631_s17] ss:$0 sm:$0xff] }
0x182b   : > { %v2168_v20 = vpop.f32.mrb[34].mxu0 }
0x182c   : > { %v2171_v21 = vadd.f32 %v2166_v18, %v3400_v13  ;;  %v2793_v22 = vpop.f32.mrb[35].mxu0  ;;  %v2898_v13 = vld [vmem:[%s3626_s12 + $0x18] sm:$0xff]  }
0x182d   : > { %2797 = vmatpush3.bf16.msra.mxu1 %v2898_v13 }
0x182e   : > { %v2176_v24 = vsel %vm732_vm1, %v2171_v21, 0.0 }
0x182f   : > { %2177 = vadd.xlane.f32.xlu0 %v2176_v24 }
0x18bc   : > { %v2178_v25 = vpop.xlane.xlu0 %2177 }
0x18bd   : > { %v2179_v26 = vmul.f32 0.03125, %v2178_v25 }
0x18bf   : > { %v2180_v27 = vsub.f32 %v2171_v21, %v2179_v26 }
0x18c1   : > { %v2181_v28 = vmul.f32 %v2180_v27, %v2180_v27 }
0x18c3   : > { %v2182_v29 = vsel %vm732_vm1, %v2181_v28, 0.0 }
0x18c4   : > { %2183 = vadd.xlane.f32.xlu1 %v2182_v29 }
0x1951   : > { %v2184_v31 = vpop.xlane.xlu1 %2183 }
0x1952   : > { %v2185_v8 = vmul.f32 0.03125, %v2184_v31 }
0x1954   : > { %v2186_v33 = vadd.f32 1e-06, %v2185_v8 }
0x1956   : > { %2943 = vrsqrt.f32 %v2186_v33 }
0x1960   : > { %v2944_v34 = vpop.eup %2943 }
0x1961   : > { %v2188_v36 = vmul.f32 %v2944_v34, %v2180_v27 }
0x1963   : > { %v2195_v38 = vmul.f32 %v2553_v35, %v2188_v36 }
0x1965   : > { %v2202_v39 = vadd.f32 %v2554_v37, %v2195_v38 }
0x1967   : > { %v2203_v40 = vpack.c.bf16 %v2202_v39, %v2202_v39 }
0x1969   : > { %2799 = vmatmul.mubr.msk.bf16.vlgmr.msra.gmra.mrb[56].mxu1 %vm785_vm3, %v2203_v40 }
0x1a3c   : > { %v2266_v45 = vpop.f32.mrb[56].mxu1 }
0x1a3d   : > { %v2267_v46 = vadd.f32 %v2560_v44, %v2266_v45  ;;  %v2800_v47 = vpop.f32.mrb[57].mxu1 }
0x1a3e   : > { %v2269_v48 = vpop.f32.mrb[58].mxu1 }
0x1a3f   : > { %v2273_v50 = vmul.f32 0.044715, %v2267_v46  ;;  %v2801_v51 = vpop.f32.mrb[59].mxu1  ;;  %v2272_v57 = vmul.f32 0.5, %v2267_v46 }
0x1a41   : > { %v2274_v52 = vmul.f32 %v2273_v50, %v2267_v46 }
0x1a43   : > { %v2275_v53 = vmul.f32 %v2274_v52, %v2267_v46 }
0x1a45   : > { %v2276_v54 = vadd.f32 %v2275_v53, %v2267_v46 }
0x1a47   : > { %v2277_v55 = vmul.f32 0.7978846, %v2276_v54 }
0x1a49   : > { %2945 = vtanh.f32 %v2277_v55 }
0x1a53   : > { %v2946_v56 = vpop.eup %2945 }
0x1a54   : > { %v2279_v58 = vadd.f32 1.0, %v2946_v56 }
0x1a56   : > { %v2280_v32 = vmul.f32 %v2279_v58, %v2272_v57 }
0x1a58   : > { %v2281_v59 = vpack.c.bf16 %v2280_v32, %v2280_v32 }
0x1a5a   : > { %2811 = vmatmul.mubr.msk.bf16.vlgmr.msra.gmra.mrb[36].mxu0 %vm684_vm0, %v2281_v59 }
0x1b2d   : > { %v2360_v61 = vpop.f32.mrb[36].mxu0 }
0x1b2e   : > { %v2361_v62 = vadd.f32 %v2573_v60, %v2360_v61  ;;  %v2812_v63 = vpop.f32.mrb[37].mxu0 }
0x1b2f   : > { %v2363_v0 = vpop.f32.mrb[38].mxu0 }
0x1b30   : > { %v2813_v1 = vpop.f32.mrb[39].mxu0  ;;  %v2366_v2 = vadd.f32 %v2361_v62, %v2171_v21 }
0x1b32   : > { %v2369_v3 = vsel %vm732_vm1, %v2366_v2, 0.0 }
0x1b33   : > { %2370 = vadd.xlane.f32.xlu0 %v2369_v3 }
0x1bc0   : > { %v2371_v4 = vpop.xlane.xlu0 %2370 }
0x1bc1   : > { %v2372_v5 = vmul.f32 0.03125, %v2371_v4 }
0x1bc3   : > { %v2373_v6 = vsub.f32 %v2366_v2, %v2372_v5 }
0x1bc5   : > { %v2374_v7 = vmul.f32 %v2373_v6, %v2373_v6 }
0x1bc7   : > { %v2375_v9 = vsel %vm732_vm1, %v2374_v7, 0.0 }
0x1bc8   : > { %2376 = vadd.xlane.f32.xlu0 %v2375_v9 }
0x1c55   : > { %v2377_v49 = vpop.xlane.xlu0 %2376 }
0x1c56   : > { %v2378_v10 = vmul.f32 0.03125, %v2377_v49 }
0x1c58   : > { %v2379_v11 = vadd.f32 1e-06, %v2378_v10 }
0x1c5a   : > { %2947 = vrsqrt.f32 %v2379_v11 }
0x1c64   : > { %v2948_v12 = vpop.eup %2947 }
0x1c65   : > { %v2381_v15 = vmul.f32 %v2948_v12, %v2373_v6 }
0x1c67   : > { %v2388_v17 = vmul.f32 %v2579_v14, %v2381_v15 }
0x1c69   : > { %v2395_v18 = vadd.f32 %v2580_v16, %v2388_v17 }
0x1c6b   : > { %2396 = vst.msk [vmem:[%s568_s29] sm:$0xf] %vm732_vm1, %v2395_v18 }
0x1c6c   : > { %2962 = shalt.err (!%p2959_p3)
}
0x1c6d   : > { %s2963_s30 = scalar_lea.hbm %s3571_s3, 64  ;;  %s2967_s29 = scalar_lea.hbm %s3678_s18, 128 }
0x1c6e   : > { %p2964_p4 = scmp.ne.s32.totalorder %s3571_s3, %s2963_s30  ;;  %p2968_p9 = scmp.lt.u32.totalorder %s3571_s3, %s3678_s18 }
0x1c6f   : > { %p2969_p10 = scmp.lt.u32.totalorder %s2967_s29, %s2963_s30  ;;  %p2971_p12 = scmp.lt.u32.totalorder %s2963_s30, %s3571_s3 }
0x1c70   : > { %p2965_p7 = pnand %p2964_p4, %p3164_p5 }
0x1c71   : > { %p2970_p11 = por %p2969_p10, %p2968_p9 }
0x1c72   : > { %p2966_p8 = pneg %p2965_p7 }
0x1c73   : > { %p2972_p13 = por %p2971_p12, %p2970_p11 }
0x1c75   : > { %p2973_p0 = pnand %p2972_p13, %p2966_p8 }
0x1c77   : > { %2976 = shalt.err (!%p2973_p0)
}
0x1c78   : > { %2814 = dma.vmem_to_hbm [thread:$0]  (%p3164_p5), %s3573_s20, 64, %s3571_s3, %s2398_s25  }
0x1c79 PF: > { %s3679_s23 = sld [smem:[#allocation7_spill]]  ;;  %s3680_s0 = sld [smem:[#allocation5_spill]] }
0x1c7f   : > { %p2820_p1 = scmp.ge.s32.totalorder %s3679_s23, 2  ;;  %s2423_s21 = sand.u32 1, %s3680_s0  }
0x1c80   : > { %s2424_s24 = scalar_lea.sflag [#allocation3], %s2423_s21 }
0x1c81   : > { %p2817_p2 = pnand %p2820_p1, %p3168_p6 }
0x1c83   : > { %2994 = dma.done.wait (!%p2817_p2), %s2424_s24, 64  }
0x1c84   : > { %2996 = vsyncadd (!%p2817_p2), %s2424_s24, 4294967232  ;;  %s3682_s30 = sld [smem:[#allocation8_spill]]  ;;  %s3683_s19 = sld [smem:[#allocation6_spill]] }
0x1c85   : > { %s3684_s29 = sld [smem:[#allocation9_spill]]  ;;  %s3685_s27 = smov %s3003_s28 }
0x1c8a   : > { %p28_p3 = scmp.ge.s32.totalorder %s3682_s30, 4   ;;  %s3686_s28 = smov %s3683_s19 }
0x1c8c   :  { %30 = sbr.rel (!%p28_p3) target bundleno = 9 (0x9), region = 139 }
0x1c93   :  { %2429 = vsyncpa [#allocation3], 1 }
0x1c94   :  { %2431 = vsyncpa [#allocation3 + $0x1], 1 }

</bundles_post_ra>
